<compile_context>
chip_gen: v7x
topology: tpu7x:2x2x1
jax: 0.10.0
libtpu: 0.0.40
codegen_flags: <defaults>
</compile_context>

<pallas_src>
import functools

import jax
import jax.numpy as jnp
from jax.experimental import pallas as pl
from jax.experimental.pallas import tpu as pltpu


_MASK_BIAS = -9.0e15   # matches the PyTorch -9e15 "zero_vec" mask value


def _sfp_kernel(el_ref, er_ref, h_ref, s_ref, out_ref, *, alpha, concat):
    # e[i,j] = leakyrelu(e_l[i] + e_r[j]) + s_prep[i,j]
    #   e_l / e_r are pre-scaled by |W_ei| on the host,
    #   s_prep = |W_si|*s + (adj>0 ? 0 : -9e15)  (mask folded on the host, bf16 stream)
    z = el_ref[...] + er_ref[...]                       # (TM,1)+(1,Np) -> (TM,Np)
    e = jnp.where(z > 0, z, alpha * z)                  # leakyrelu
    e = e + s_ref[...].astype(jnp.float32)              # bf16 -> f32 on the VPU

    # numerically-stable row softmax (dim=1); EUP approx reciprocal for the denom
    e = e - jnp.max(e, axis=1, keepdims=True)
    p = jnp.exp(e)
    att = p * pl.reciprocal(jnp.sum(p, axis=1, keepdims=True), approx=True)

    # TODO(synk): F.dropout on attention skipped (eval-mode semantics; no RNG parity).

    # h' = attention @ h  -- bf16 x bf16 MXU path, f32 accumulation, lane-dense out
    h_prime = jnp.dot(att.astype(jnp.bfloat16), h_ref[...],
                      preferred_element_type=jnp.float32)

    if concat:
        # ELU; clamp the exp argument so the untaken branch never overflows.
        out_ref[...] = jnp.where(h_prime > 0, h_prime,
                                 jnp.exp(jnp.minimum(h_prime, 0.0)) - 1.0)
    else:
        out_ref[...] = h_prime


def _round_up(x, m):
    return ((x + m - 1) // m) * m


def _vmem_budget_bytes():
    # Derive the scoped-VMEM limit from the actual chip (128 MiB on v5e/v6e,
    # 64 MiB on v7x) instead of a hard-coded 64 MiB cap; fall back conservatively.
    try:
        cap = int(pltpu.get_tpu_info().vmem_capacity_bytes)
    except Exception:
        cap = 64 * 1024 * 1024
    return max(32 * 1024 * 1024, int(cap * 0.78))


def _pick_row_tile(n_pad, f_pad, budget):
    # Resident (single-buffered) blocks: bf16 h + f32 e_r row.
    resident = n_pad * f_pad * 2 + n_pad * 4
    for tm in (256, 128, 64, 32):
        if n_pad % tm:
            continue
        per_tile = (2 * tm * n_pad * 2 +      # double-buffered bf16 s_prep strip
                    2 * tm * 4 +              # double-buffered e_l column
                    2 * tm * f_pad * 4 +      # double-buffered f32 output tile
                    4 * tm * n_pad * 4)       # f32 in-kernel temporaries (z/e/p/att)
        if resident + per_tile <= budget:
            return tm
    # TODO(synk): for very large N (v7x 64 MiB VMEM) add a column grid axis with an
    # online (flash-style) softmax instead of only shrinking the row tile.
    return 32


def structural_fingerprint_layer(x, W, a, W_si, W_ei, adj_ad, adj,
                                 *, alpha=0.2, concat=True):
    """JAX/Pallas equivalent of StructuralFingerprintLayer.forward (eval mode)."""
    x = jnp.asarray(x, jnp.float32)
    W = jnp.asarray(W, jnp.float32)
    a = jnp.asarray(a, jnp.float32)
    N = x.shape[0]
    f_out = W.shape[1]
    f_pad = _round_up(f_out, 128)     # lane-dense h / output width
    n_pad = _round_up(N, 128)         # row padding -> always tiled & pipelined

    # Hoist the tiny projections into one fused matmul; fold |W_ei| into the
    # attention-vector columns (leakyrelu(c*z) == c*leakyrelu(z) for c >= 0).
    #   y = x @ [W | |W_ei|*(W@a1) | |W_ei|*(W@a2)]
    wei = jnp.abs(jnp.asarray(W_ei, jnp.float32)).reshape(())
    wsi = jnp.abs(jnp.asarray(W_si, jnp.float32)).reshape(())
    a1 = a[:f_out, :]
    a2 = a[f_out:, :]
    w_fused = jnp.concatenate([W, wei * (W @ a1), wei * (W @ a2)], axis=1)
    y = x @ w_fused                                               # (N, F_out+2)

    h = jnp.pad(y[:, :f_out],
                ((0, n_pad - N), (0, f_pad - f_out))).astype(jnp.bfloat16)
    e_l = jnp.pad(y[:, f_out:f_out + 1], ((0, n_pad - N), (0, 0)))        # (Np, 1)
    e_r = jnp.pad(y[:, f_out + 1:f_out + 2].reshape(1, N),
                  ((0, 0), (0, n_pad - N)))                               # (1, Np)

    # Fold |W_si| and the adjacency mask bias into a single bf16 structural stream.
    # (Rows with zero edges anywhere would degrade from uniform to near-one-hot
    #  attention; GAT inputs always carry self-loops so this never triggers.)
    s_prep = wsi * adj_ad.astype(jnp.float32) + jnp.where(adj > 0, 0.0, _MASK_BIAS)
    s_prep = jnp.pad(s_prep, ((0, n_pad - N), (0, n_pad - N)),
                     constant_values=_MASK_BIAS).astype(jnp.bfloat16)

    budget = _vmem_budget_bytes()
    tm = _pick_row_tile(n_pad, f_pad, budget)
    grid = (n_pad // tm,)

    kernel = functools.partial(_sfp_kernel, alpha=float(alpha), concat=concat)

    # TODO(synk): on v7x, verify "parallel" shards the row axis across both
    # TensorCores; otherwise switch to pltpu.CORE_PARALLEL / a core_map mesh.
    out_pad = pl.pallas_call(
        kernel,
        out_shape=jax.ShapeDtypeStruct((n_pad, f_pad), jnp.float32),
        grid=grid,
        in_specs=[
            pl.BlockSpec((tm, 1), lambda i: (i, 0)),              # e_l row-block
            pl.BlockSpec((1, n_pad), lambda i: (0, 0),
                         pipeline_mode=pl.Buffered(1)),           # e_r (resident row)
            pl.BlockSpec((n_pad, f_pad), lambda i: (0, 0),
                         pipeline_mode=pl.Buffered(1)),           # h (resident, bf16)
            pl.BlockSpec((tm, n_pad), lambda i: (i, 0)),          # s_prep row-block (bf16)
        ],
        out_specs=pl.BlockSpec((tm, f_pad), lambda i: (i, 0)),
        compiler_params=pltpu.CompilerParams(
            dimension_semantics=("parallel",),
            vmem_limit_bytes=budget),
    )(e_l, e_r, h, s_prep)

    # TODO(synk): downstream consumers that tolerate (n_pad, f_pad) padding can take
    # out_pad directly and skip this slice copy.
    return out_pad[:N, :f_out]


def _xavier_uniform(key, shape, gain=1.414):
    fan_in, fan_out = shape[0], shape[1]
    bound = gain * jnp.sqrt(6.0 / (fan_in + fan_out))
    return jax.random.uniform(key, shape, jnp.float32, -bound, bound)


def _reference(x, W, a, W_si, W_ei, adj_ad, adj, alpha=0.2, concat=True):
    """Pure-JAX reference mirroring the PyTorch forward (eval mode)."""
    h = x @ W
    f_out = W.shape[1]
    e = h @ a[:f_out] + (h @ a[f_out:]).T
    e = jnp.where(e > 0, e, alpha * e)
    e = jnp.abs(W_ei) * e + jnp.abs(W_si) * adj_ad
    att = jnp.where(adj > 0, e, -9e15)
    att = jax.nn.softmax(att, axis=1)
    hp = att @ h
    return jax.nn.elu(hp) if concat else hp


if __name__ == "__main__":
    key = jax.random.PRNGKey(0)
    k_x, k_w, k_a, k_si, k_ei, k_adj, k_s = jax.random.split(key, 7)

    N, F_IN, F_OUT = 256, 16, 8
    ALPHA = 0.2

    x = jax.random.normal(k_x, (N, F_IN), jnp.float32)

    # deterministic parameter init (xavier_uniform, gain=1.414) as in __init__
    W = _xavier_uniform(k_w, (F_IN, F_OUT))
    a = _xavier_uniform(k_a, (2 * F_OUT, 1))
    W_si = _xavier_uniform(k_si, (1, 1))
    W_ei = _xavier_uniform(k_ei, (1, 1))

    # sparse-ish adjacency with self loops, and structural matrix s
    adj = (jax.random.uniform(k_adj, (N, N)) > 0.9).astype(jnp.float32)
    adj = jnp.maximum(adj, jnp.eye(N, dtype=jnp.float32))
    adj_ad = jax.random.uniform(k_s, (N, N), jnp.float32)

    out = structural_fingerprint_layer(
        x, W, a, W_si, W_ei, adj_ad, adj, alpha=ALPHA, concat=True)
    out = jax.block_until_ready(out)

    ref = _reference(x, W, a, W_si, W_ei, adj_ad, adj, alpha=ALPHA, concat=True)
    assert out.shape == (N, F_OUT)
    # bf16 structural / h / att streams + approx reciprocal (intentional, see header)
    # -> validate at 1e-2; the all-f32 variant matched at 1e-3.
    assert jnp.allclose(out, ref, atol=1e-2, rtol=1e-2), "mismatch vs reference"

    print("KERNEL_OK")
</pallas_src>

<mosaic_0001>
module attributes {stable_mosaic.version = 11 : i64} {
  func.func @_sfp_kernel(%arg0: i32, %arg1: memref<256x1xf32, #tpu.memory_space<vmem>>, %arg2: memref<1x256xf32, #tpu.memory_space<vmem>>, %arg3: memref<256x128xbf16, #tpu.memory_space<vmem>>, %arg4: memref<256x256xbf16, #tpu.memory_space<vmem>>, %arg5: memref<256x128xf32, #tpu.memory_space<vmem>>) attributes {dimension_semantics = [#tpu.dimension_semantics<parallel>], iteration_bounds = array<i64: 1>, scalar_prefetch = 0 : i64, scratch_operands = 0 : i64, tpu.core_type = #tpu.core_type<tc>, window_params = [{transform_indices = @transform_0, window_bounds = array<i64: 256, 1>}, {pipeline_mode = #tpu.pipeline_mode<synchronous>, transform_indices = @transform_1, window_bounds = array<i64: 1, 256>}, {pipeline_mode = #tpu.pipeline_mode<synchronous>, transform_indices = @transform_2, window_bounds = array<i64: 256, 128>}, {transform_indices = @transform_3, window_bounds = array<i64: 256, 256>}, {transform_indices = @transform_4, window_bounds = array<i64: 256, 128>}]} {
    %c0 = arith.constant 0 : index
    %c0_0 = arith.constant 0 : index
    %0 = vector.load %arg1[%c0, %c0_0] : memref<256x1xf32, #tpu.memory_space<vmem>>, vector<256x1xf32>
    %c0_1 = arith.constant 0 : index
    %c0_2 = arith.constant 0 : index
    %1 = vector.load %arg2[%c0_1, %c0_2] : memref<1x256xf32, #tpu.memory_space<vmem>>, vector<1x256xf32>
    %2 = vector.broadcast %0 : vector<256x1xf32> to vector<256x256xf32>
    %3 = vector.broadcast %1 : vector<1x256xf32> to vector<256x256xf32>
    %4 = arith.addf %2, %3 : vector<256x256xf32>
    %cst = arith.constant 0.000000e+00 : f32
    %5 = vector.broadcast %cst : f32 to vector<256x256xf32>
    %6 = arith.cmpf ogt, %4, %5 : vector<256x256xf32>
    %cst_3 = arith.constant 2.000000e-01 : f32
    %7 = vector.broadcast %cst_3 : f32 to vector<256x256xf32>
    %8 = arith.mulf %7, %4 : vector<256x256xf32>
    %9 = arith.select %6, %4, %8 : vector<256x256xi1>, vector<256x256xf32>
    %c0_4 = arith.constant 0 : index
    %c0_5 = arith.constant 0 : index
    %10 = vector.load %arg4[%c0_4, %c0_5] : memref<256x256xbf16, #tpu.memory_space<vmem>>, vector<256x256xbf16>
    %11 = arith.extf %10 : vector<256x256xbf16> to vector<256x256xf32>
    %12 = arith.addf %9, %11 : vector<256x256xf32>
    %cst_6 = arith.constant dense<0xFF800000> : vector<256xf32>
    %13 = vector.multi_reduction <maximumf>, %12, %cst_6 [1] : vector<256x256xf32> to vector<256xf32>
    %14 = vector.shape_cast %13 : vector<256xf32> to vector<256x1xf32>
    %15 = vector.broadcast %14 : vector<256x1xf32> to vector<256x256xf32>
    %16 = arith.subf %12, %15 : vector<256x256xf32>
    %17 = math.exp %16 : vector<256x256xf32>
    %cst_7 = arith.constant dense<0.000000e+00> : vector<256xf32>
    %18 = vector.multi_reduction <add>, %17, %cst_7 [1] : vector<256x256xf32> to vector<256xf32>
    %19 = vector.shape_cast %18 : vector<256xf32> to vector<256x1xf32>
    %20 = tpu.reciprocal %19 {approx = true} : vector<256x1xf32> -> vector<256x1xf32>
    %21 = vector.broadcast %20 : vector<256x1xf32> to vector<256x256xf32>
    %22 = arith.mulf %17, %21 : vector<256x256xf32>
    %23 = arith.truncf %22 : vector<256x256xf32> to vector<256x256xbf16>
    %c0_8 = arith.constant 0 : index
    %c0_9 = arith.constant 0 : index
    %24 = vector.load %arg3[%c0_8, %c0_9] : memref<256x128xbf16, #tpu.memory_space<vmem>>, vector<256x128xbf16>
    %cst_10 = arith.constant dense<0.000000e+00> : vector<256x128xf32>
    %25 = tpu.matmul %23, %24, %cst_10 {dimension_numbers = #tpu.dot_dimension_numbers<[1], [0], [0], [1], [0, 0, 1, 1], [], []>} : vector<256x256xbf16>, vector<256x128xbf16>, vector<256x128xf32> -> vector<256x128xf32>
    %cst_11 = arith.constant 0.000000e+00 : f32
    %26 = vector.broadcast %cst_11 : f32 to vector<256x128xf32>
    %27 = arith.cmpf ogt, %25, %26 : vector<256x128xf32>
    %cst_12 = arith.constant 0.000000e+00 : f32
    %28 = vector.broadcast %cst_12 : f32 to vector<256x128xf32>
    %29 = arith.minimumf %25, %28 : vector<256x128xf32>
    %30 = math.exp %29 : vector<256x128xf32>
    %cst_13 = arith.constant 1.000000e+00 : f32
    %31 = vector.broadcast %cst_13 : f32 to vector<256x128xf32>
    %32 = arith.subf %30, %31 : vector<256x128xf32>
    %33 = arith.select %27, %25, %32 : vector<256x128xi1>, vector<256x128xf32>
    %c0_14 = arith.constant 0 : index
    %c0_15 = arith.constant 0 : index
    %34 = vector.load %arg5[%c0_14, %c0_15] : memref<256x128xf32, #tpu.memory_space<vmem>>, vector<256x128xf32>
    tpu.vector_store %arg5[%c0_14, %c0_15], %33 {strides = array<i32>} : memref<256x128xf32, #tpu.memory_space<vmem>>, vector<256x128xf32>,
    return
  }
  func.func @transform_0(%arg0: i32) -> (i32, i32) {
    %c0_i32 = arith.constant 0 : i32
    %c0_i32_0 = arith.constant 0 : i32
    return %arg0, %c0_i32 : i32, i32
  }
  func.func @transform_1(%arg0: i32) -> (i32, i32) {
    %c0_i32 = arith.constant 0 : i32
    %c0_i32_0 = arith.constant 0 : i32
    %c0_i32_1 = arith.constant 0 : i32
    return %c0_i32, %c0_i32_0 : i32, i32
  }
  func.func @transform_2(%arg0: i32) -> (i32, i32) {
    %c0_i32 = arith.constant 0 : i32
    %c0_i32_0 = arith.constant 0 : i32
    %c0_i32_1 = arith.constant 0 : i32
    return %c0_i32, %c0_i32_0 : i32, i32
  }
  func.func @transform_3(%arg0: i32) -> (i32, i32) {
    %c0_i32 = arith.constant 0 : i32
    %c0_i32_0 = arith.constant 0 : i32
    return %arg0, %c0_i32 : i32, i32
  }
  func.func @transform_4(%arg0: i32) -> (i32, i32) {
    %c0_i32 = arith.constant 0 : i32
    %c0_i32_0 = arith.constant 0 : i32
    return %arg0, %c0_i32 : i32, i32
  }
}

</mosaic_0001>

<bundles_post_ra>
// kernel: tpu_custom_call.1
= control target key start
LH: loop header
LB: loop body
LE: loop exit
PB: predicated region body
PF: predicated region fallthrough
CT: control target
= control target key end

     0   :  { %9 = vsyncpa [#allocation3], 0  ;;  %s3697_s0 = inlined_call_operand.vmem [shape: f32[256,1], index: 0, kind: input, shape index: {}]   ;;  %s3698_s1 = inlined_call_operand.vmem [shape: f32[1,256], index: 1, kind: input, shape index: {}]   ;;  %s3699_s2 = inlined_call_operand.hbm [shape: bf16[256,128], index: 2, kind: input, shape index: {}]   ;;  %s3700_s3 = inlined_call_operand.vmem [shape: bf16[256,256], index: 3, kind: input, shape index: {}]   ;;  %s3701_s4 = inlined_call_operand.hbm [shape: f32[256,128], index: 4, kind: output, shape index: {}]  }
   0x1   :  { %10 = vsyncpa [#allocation4], 0  ;;  %s2200_s15 = smov [#allocation2]   ;;  %s2152_s19 = scalar_lea.hbm %s3699_s2, 2048 }
   0x2   :  { %s20_s16 = sshll.u32 %s2200_s15, 4  ;;  %p2153_p0 = scmp.ne.s32.totalorder %s3699_s2, %s2152_s19  ;;  %s21_s16 = int_to_ptr.vmem [resolvable:$true] %s20_s16 }
   0x3   :  { %p2156_p1 = scmp.lt.u32.totalorder %s2152_s19, %s3699_s2 }
   0x5   :  { %p2158_p2 = pnand %p2156_p1, %p2153_p0 }
   0x7   :  { %2161 = shalt.err (!%p2158_p2)
}
   0x8   :  { %s2162_s24 = scalar_lea.vmem %s21_s16, 2048  ;;  %p2167_p4 = scmp.lt.s32.totalorder %s21_s16, %s21_s16 }
   0x9   :  { %p2163_p3 = scmp.ne.s32.totalorder %s21_s16, %s2162_s24  ;;  %p2168_p5 = scmp.lt.s32.totalorder %s2162_s24, %s2162_s24 }
   0xb   :  { %p2169_p6 = por %p2168_p5, %p2167_p4 }
   0xd   :  { %p2170_p7 = pnand %p2169_p6, %p2163_p3 }
   0xf   :  { %2173 = shalt.err (!%p2170_p7)
}
  0x10   :  { %s2201_s25 = smov 64   ;;  %s2202_s26 = smov 4  }
  0x11   :  { %26 = dma.hbm_to_vmem [thread:$0]  %s3699_s2, 2048, %s21_s16, [#allocation3], %s2201_s25, %s2201_s25, %s2202_s26  }
  0x12   :  { %2196 = dma.done.wait [#allocation3], 2048  }
  0x13   :  { %2197 = vsyncadd [#allocation3], 4294965248  ;;  %v2203_v0 = vmov 0   ;;  %v49_v1 = vld [vmem:[%s3697_s0 + $0x80] sm:$0xff]  ;;  %v50_v3 = vld [vmem:[%s3697_s0 + $0x88] sm:$0xff]  ;;  %v227_v33 = vlaneseq }
  0x14   :  { %1879 = vset.pattern.permute.xlu1 %v2203_v0  ;;  %1878 = vset.pattern.permute.xlu0 %v2203_v0  ;;  %v33_v2 = vld [vmem:[%s3697_s0] sm:$0xff]  ;;  %v34_v4 = vld [vmem:[%s3697_s0 + $0x8] sm:$0xff]  ;;  %v36_v5 = vld [vmem:[%s3697_s0 + $0x18] sm:$0xff] }
  0x15   :  { %148 = vperm.xlu1 %1879, %v49_v1   ;;  %68 = vperm.xlu0 %1878, %v33_v2   ;;  %v35_v6 = vld [vmem:[%s3697_s0 + $0x10] sm:$0xff]  ;;  %v52_v7 = vld [vmem:[%s3697_s0 + $0x98] sm:$0xff]  ;;  %v38_v9 = vld [vmem:[%s3697_s0 + $0x28] sm:$0xff]  ;;  %v228_v34 = vshrl.u32 %v227_v33, 7 }
  0x16   :  { %v51_v8 = vld [vmem:[%s3697_s0 + $0x90] sm:$0xff]  ;;  %v37_v10 = vld [vmem:[%s3697_s0 + $0x20] sm:$0xff]  ;;  %v54_v11 = vld [vmem:[%s3697_s0 + $0xa8] sm:$0xff] }
  0x17   :  { %v53_v12 = vld [vmem:[%s3697_s0 + $0xa0] sm:$0xff]  ;;  %v40_v13 = vld [vmem:[%s3697_s0 + $0x38] sm:$0xff]  ;;  %v39_v14 = vld [vmem:[%s3697_s0 + $0x30] sm:$0xff]  ;;  %v229_v35 = vsub.s32 0, %v228_v34  ;;  %v233_v36 = vsub.s32 1, %v228_v34 }
  0x18   :  { %v56_v15 = vld [vmem:[%s3697_s0 + $0xb8] sm:$0xff]  ;;  %v55_v16 = vld [vmem:[%s3697_s0 + $0xb0] sm:$0xff]  ;;  %v42_v17 = vld [vmem:[%s3697_s0 + $0x48] sm:$0xff] }
  0x19   :  { %153 = vperm.xlu1 %1879, %v50_v3   ;;  %73 = vperm.xlu0 %1878, %v34_v4   ;;  %v41_v18 = vld [vmem:[%s3697_s0 + $0x40] sm:$0xff]  ;;  %v58_v19 = vld [vmem:[%s3697_s0 + $0xc8] sm:$0xff]  ;;  %v44_v21 = vld [vmem:[%s3697_s0 + $0x58] sm:$0xff] }
  0x1a   :  { %v57_v20 = vld [vmem:[%s3697_s0 + $0xc0] sm:$0xff]  ;;  %v43_v22 = vld [vmem:[%s3697_s0 + $0x50] sm:$0xff]  ;;  %v60_v23 = vld [vmem:[%s3697_s0 + $0xd8] sm:$0xff] }
  0x1b   :  { %v59_v24 = vld [vmem:[%s3697_s0 + $0xd0] sm:$0xff]  ;;  %v46_v25 = vld [vmem:[%s3697_s0 + $0x68] sm:$0xff]  ;;  %v45_v26 = vld [vmem:[%s3697_s0 + $0x60] sm:$0xff] }
  0x1c   :  { %v62_v27 = vld [vmem:[%s3697_s0 + $0xe8] sm:$0xff]  ;;  %v61_v28 = vld [vmem:[%s3697_s0 + $0xe0] sm:$0xff]  ;;  %v48_v29 = vld [vmem:[%s3697_s0 + $0x78] sm:$0xff] }
  0x1d   :  { %83 = vperm.xlu1 %1879, %v36_v5   ;;  %78 = vperm.xlu0 %1878, %v35_v6   ;;  %v47_v30 = vld [vmem:[%s3697_s0 + $0x70] sm:$0xff]  ;;  %v64_v31 = vld [vmem:[%s3697_s0 + $0xf8] sm:$0xff]  ;;  %v65_v37 = vld [vmem:[%s3698_s1] sm:$0x3] }
  0x1e   :  { %v63_v32 = vld [vmem:[%s3697_s0 + $0xf0] sm:$0xff]  ;;  %v2346_v38 = vld [vmem:[%s3700_s3] sm:$0xff]  ;;  %v2356_v40 = vld [vmem:[%s3700_s3 + $0x8] sm:$0xff]  ;;  %v2368_v43 = vrot.slane %v65_v37, %v229_v35  ;;  %v2370_v44 = vrot.slane %v65_v37, %v233_v36 }
  0x1f   :  { %v2351_v39 = vld [vmem:[%s3700_s3 + $0x80] sm:$0xff]  ;;  %v2361_v41 = vld [vmem:[%s3700_s3 + $0x88] sm:$0xff]  ;;  %v2366_v42 = vld [vmem:[%s3700_s3 + $0x10] sm:$0xff]  ;;  %v525_v45 = vunpack.c.l.bf16 %v2346_v38  ;;  %v526_v48 = vunpack.c.h.bf16 %v2346_v38  ;;  %v527_v51 = vunpack.c.l.bf16 %v2356_v40  ;;  %v528_v54 = vunpack.c.h.bf16 %v2356_v40 }
  0x20   :  { %v2376_v46 = vld [vmem:[%s3700_s3 + $0x18] sm:$0xff]  ;;  %v2381_v47 = vld [vmem:[%s3700_s3 + $0x90] sm:$0xff]  ;;  %v557_v49 = vunpack.c.l.bf16 %v2351_v39  ;;  %v558_v50 = vunpack.c.h.bf16 %v2351_v39  ;;  %v2395_v53 = vld [vmem:[%s3700_s3 + $0x20] sm:$0xff]  ;;  %v559_v55 = vunpack.c.l.bf16 %v2361_v41  ;;  %v560_v56 = vunpack.c.h.bf16 %v2361_v41 }
  0x21   :  { %163 = vperm.xlu1 %1879, %v52_v7   ;;  %158 = vperm.xlu0 %1878, %v51_v8   ;;  %v2390_v52 = vld [vmem:[%s3700_s3 + $0x98] sm:$0xff]  ;;  %v2404_v58 = vld [vmem:[%s3700_s3 + $0x28] sm:$0xff]  ;;  %v2409_v59 = vld [vmem:[%s3700_s3 + $0xa0] sm:$0xff]  ;;  %v3755_v41 = vunpack.c.h.bf16 %v2366_v42 }
  0x22   :  { %v2418_v0 = vld [vmem:[%s3700_s3 + $0xa8] sm:$0xff]  ;;  %v2423_v1 = vld [vmem:[%s3700_s3 + $0x30] sm:$0xff]  ;;  %v2432_v6 = vld [vmem:[%s3700_s3 + $0x38] sm:$0xff] }
  0x23   :  { %v2437_v7 = vld [vmem:[%s3700_s3 + $0xb0] sm:$0xff]  ;;  %v2492_v34 = vld [vmem:[%s3700_s3 + $0x58] sm:$0xff] }
  0x24   :  { %v2497_v35 = vld [vmem:[%s3700_s3 + $0xd0] sm:$0xff] }
  0x25   :  { %93 = vperm.xlu1 %1879, %v38_v9   ;;  %88 = vperm.xlu0 %1878, %v37_v10   ;;  %v2569_v2 = vld [vmem:[%s3700_s3 + $0xf0] sm:$0xff] }
  0x29   :  { %173 = vperm.xlu1 %1879, %v54_v11   ;;  %168 = vperm.xlu0 %1878, %v53_v12   ;;  %v2446_v12 = vld [vmem:[%s3700_s3 + $0xb8] sm:$0xff] }
  0x2d   :  { %103 = vperm.xlu1 %1879, %v40_v13   ;;  %98 = vperm.xlu0 %1878, %v39_v14   ;;  %v2451_v13 = vld [vmem:[%s3700_s3 + $0x40] sm:$0xff] }
  0x31   :  { %183 = vperm.xlu1 %1879, %v56_v15   ;;  %178 = vperm.xlu0 %1878, %v55_v16  }
  0x35   :  { %113 = vperm.xlu1 %1879, %v42_v17   ;;  %108 = vperm.xlu0 %1878, %v41_v18   ;;  %v2460_v18 = vld [vmem:[%s3700_s3 + $0x48] sm:$0xff]  ;;  %v2545_v17 = vld [vmem:[%s3700_s3 + $0x70] sm:$0xff] }
  0x39   :  { %193 = vperm.xlu1 %1879, %v58_v19   ;;  %188 = vperm.xlu0 %1878, %v57_v20   ;;  %v2465_v19 = vld [vmem:[%s3700_s3 + $0xc0] sm:$0xff] }
  0x3d   :  { %123 = vperm.xlu1 %1879, %v44_v21   ;;  %118 = vperm.xlu0 %1878, %v43_v22   ;;  %v2524_v21 = vld [vmem:[%s3700_s3 + $0x68] sm:$0xff] }
  0x41   :  { %203 = vperm.xlu1 %1879, %v60_v23   ;;  %198 = vperm.xlu0 %1878, %v59_v24   ;;  %v2474_v24 = vld [vmem:[%s3700_s3 + $0xc8] sm:$0xff] }
  0x45   :  { %133 = vperm.xlu1 %1879, %v46_v25   ;;  %128 = vperm.xlu0 %1878, %v45_v26   ;;  %v2479_v25 = vld [vmem:[%s3700_s3 + $0x50] sm:$0xff]  ;;  %v2533_v26 = vld [vmem:[%s3700_s3 + $0xe0] sm:$0xff] }
  0x49   :  { %213 = vperm.xlu1 %1879, %v62_v27   ;;  %208 = vperm.xlu0 %1878, %v61_v28   ;;  %v2511_v28 = vld [vmem:[%s3700_s3 + $0x60] sm:$0xff] }
  0x4d   :  { %143 = vperm.xlu1 %1879, %v48_v29   ;;  %138 = vperm.xlu0 %1878, %v47_v30   ;;  %v2506_v29 = vld [vmem:[%s3700_s3 + $0xd8] sm:$0xff] }
  0x51   :  { %223 = vperm.xlu1 %1879, %v64_v31   ;;  %218 = vperm.xlu0 %1878, %v63_v32  }
  0x94   :  { %v149_v36 = vpop.permute.xlu1 %148  ;;  %v69_v37 = vpop.permute.xlu0 %68 }
  0x95   :  { %v269_v27 = vadd.f32 %v2368_v43, %v149_v36  ;;  %v270_v30 = vadd.f32 %v2370_v44, %v149_v36  ;;  %v237_v31 = vadd.f32 %v2368_v43, %v69_v37  ;;  %v238_v32 = vadd.f32 %v2370_v44, %v69_v37  ;;  %v2540_v37 = vld [vmem:[%s3700_s3 + $0xe8] sm:$0xff] }
  0x97   :  { %vm301_vm0 = vcmp.gt.f32.partialorder %v237_v31, 0.0  ;;  %vm302_vm1 = vcmp.gt.f32.partialorder %v238_v32, 0.0  ;;  %v365_v22 = vmul.f32 0.2, %v237_v31  ;;  %v366_v23 = vmul.f32 0.2, %v238_v32 }
  0x98   :  { %v154_v33 = vpop.permute.xlu1 %153  ;;  %v74_v16 = vpop.permute.xlu0 %73  ;;  %v397_v15 = vmul.f32 0.2, %v269_v27  ;;  %v398_v14 = vmul.f32 0.2, %v270_v30  ;;  %vm333_vm2 = vcmp.gt.f32.partialorder %v269_v27, 0.0  ;;  %vm334_vm3 = vcmp.gt.f32.partialorder %v270_v30, 0.0 }
  0x99   :  { %v239_v11 = vadd.f32 %v2368_v43, %v74_v16  ;;  %v240_v10 = vadd.f32 %v2370_v44, %v74_v16  ;;  %v429_v20 = vsel %vm301_vm0, %v237_v31, %v365_v22  ;;  %v430_v36 = vsel %vm302_vm1, %v238_v32, %v366_v23  ;;  %v2560_v16 = vld [vmem:[%s3700_s3 + $0x78] sm:$0xff] }
  0x9a   :  { %v271_v22 = vadd.f32 %v2368_v43, %v154_v33  ;;  %v272_v23 = vadd.f32 %v2370_v44, %v154_v33  ;;  %v461_v31 = vsel %vm333_vm2, %v269_v27, %v397_v15  ;;  %v462_v32 = vsel %vm334_vm3, %v270_v30, %v398_v14 }
  0x9b   :  { %v367_v63 = vmul.f32 0.2, %v239_v11  ;;  %v368_v62 = vmul.f32 0.2, %v240_v10  ;;  %v2573_v3 = vadd.f32 %v525_v45, %v429_v20  ;;  %v2577_v8 = vadd.f32 %v526_v48, %v430_v36 }
  0x9c   :  { %v84_v5 = vpop.permute.xlu1 %83  ;;  %v79_v4 = vpop.permute.xlu0 %78  ;;  %vm303_vm4 = vcmp.gt.f32.partialorder %v239_v11, 0.0  ;;  %vm304_vm5 = vcmp.gt.f32.partialorder %v240_v10, 0.0  ;;  %v399_v38 = vmul.f32 0.2, %v271_v22  ;;  %v2591_v36 = vadd.f32 %v557_v49, %v461_v31 }
  0x9d   :  { %v2582_v27 = vadd.f32 %v2368_v43, %v84_v5  ;;  %v241_v30 = vadd.f32 %v2368_v43, %v79_v4  ;;  %v653_v48 = vmax.f32 %v2573_v3, %v2577_v8  ;;  %v2595_v14 = vadd.f32 %v558_v50, %v462_v32 }
  0x9e   :  { %v400_v15 = vmul.f32 0.2, %v272_v23  ;;  %v242_v61 = vadd.f32 %v2370_v44, %v79_v4  ;;  %v431_v60 = vsel %vm303_vm4, %v239_v11, %v367_v63  ;;  %v432_v45 = vsel %vm304_vm5, %v240_v10, %v368_v62 }
  0x9f   :  { %3748 = vst [vmem:[#allocation8_spill] sm:$0xff] %v2595_v14  ;;  %vm335_vm6 = vcmp.gt.f32.partialorder %v271_v22, 0.0  ;;  %vm336_vm7 = vcmp.gt.f32.partialorder %v272_v23, 0.0  ;;  %v244_v20 = vadd.f32 %v2370_v44, %v84_v5  ;;  %654 = vmax.xlane.f32.xlu0 %v653_v48  ;;  %vm307_vm8 = vcmp.gt.f32.partialorder %v2582_v27, 0.0 }
  0xa0   :  { %v164_v33 = vpop.permute.xlu1 %163  ;;  %v159_v9 = vpop.permute.xlu0 %158  ;;  %vm305_vm9 = vcmp.gt.f32.partialorder %v241_v30, 0.0  ;;  %v369_v4 = vmul.f32 0.2, %v241_v30  ;;  %v701_v62 = vmax.f32 %v2591_v36, %v2595_v14  ;;  %v2613_v5 = vadd.f32 %v527_v51, %v431_v60 }
  0xa1   :  { %v2604_v39 = vadd.f32 %v2368_v43, %v164_v33  ;;  %v2607_v49 = vadd.f32 %v2370_v44, %v164_v33  ;;  %v2617_v10 = vadd.f32 %v528_v54, %v432_v45  ;;  %v370_v11 = vmul.f32 0.2, %v242_v61 }
  0xa2   :  { %3749 = vst [vmem:[#allocation9_spill] sm:$0xff] %v2613_v5  ;;  %v273_v31 = vadd.f32 %v2368_v43, %v159_v9  ;;  %v463_v32 = vsel %vm335_vm6, %v271_v22, %v399_v38  ;;  %v464_v33 = vsel %vm336_vm7, %v272_v23, %v400_v15  ;;  %vm308_vm10 = vcmp.gt.f32.partialorder %v244_v20, 0.0 }
  0xa3   :  { %3750 = vst [vmem:[#allocation10_spill] sm:$0xff] %v2617_v10  ;;  %vm306_vm11 = vcmp.gt.f32.partialorder %v242_v61, 0.0  ;;  %v274_v48 = vadd.f32 %v2370_v44, %v159_v9  ;;  %702 = vmax.xlane.f32.xlu0 %v701_v62  ;;  %v656_v51 = vmax.f32 %v2613_v5, %v2617_v10  ;;  %v371_v60 = vmul.f32 0.2, %v2582_v27 }
  0xa4   :  { %v94_v50 = vpop.permute.xlu1 %93  ;;  %v89_v63 = vpop.permute.xlu0 %88  ;;  %v372_v40 = vmul.f32 0.2, %v244_v20  ;;  %vm339_vm12 = vcmp.gt.f32.partialorder %v2604_v39, 0.0  ;;  %vm340_vm13 = vcmp.gt.f32.partialorder %v2607_v49, 0.0  ;;  %v2633_v9 = vadd.f32 %v559_v55, %v463_v32 }
  0xa5   :  { %657 = vmax.xlane.f32.xlu1 %v656_v51  ;;  %v2629_v22 = vadd.f32 %v2368_v43, %v94_v50  ;;  %v2637_v23 = vadd.f32 %v560_v56, %v464_v33  ;;  %v433_v15 = vsel %vm305_vm9, %v241_v30, %v369_v4  ;;  %v401_v38 = vmul.f32 0.2, %v273_v31 }
  0xa6   :  { %3751 = vst [vmem:[#allocation11_spill] sm:$0xff] %v2633_v9  ;;  %v2641_v62 = vadd.f32 %v2370_v44, %v94_v50  ;;  %v434_v57 = vsel %vm306_vm11, %v242_v61, %v370_v11  ;;  %v3753_v51 = vunpack.c.l.bf16 %v2366_v42  ;;  %vm337_vm14 = vcmp.gt.f32.partialorder %v273_v31, 0.0 }
  0xa7   :  { %3752 = vst [vmem:[#allocation12_spill] sm:$0xff] %v2637_v23  ;;  %v402_v5 = vmul.f32 0.2, %v274_v48  ;;  %v704_v55 = vmax.f32 %v2633_v9, %v2637_v23  ;;  %v2652_v56 = vadd.f32 %v3755_v41, %v434_v57  ;;  %v403_v30 = vmul.f32 0.2, %v2604_v39 }
  0xa8   :  { %v174_v54 = vpop.permute.xlu1 %173  ;;  %v169_v45 = vpop.permute.xlu0 %168  ;;  %v2646_v10 = vadd.f32 %v3753_v51, %v433_v15  ;;  %vm338_vm15 = vcmp.gt.f32.partialorder %v274_v48, 0.0  ;;  %v245_v50 = vadd.f32 %v2368_v43, %v89_v63  ;;  %v246_v61 = vadd.f32 %v2370_v44, %v89_v63 }
  0xa9   :  { %3756 = vst [vmem:[#allocation14_spill] sm:$0xff] %v2652_v56  ;;  %v404_v32 = vmul.f32 0.2, %v2607_v49  ;;  %v375_v33 = vmul.f32 0.2, %v2629_v22  ;;  %705 = vmax.xlane.f32.xlu0 %v704_v55  ;;  %v2662_v42 = vadd.f32 %v2368_v43, %v174_v54  ;;  %vm311_vm0 = vcmp.gt.f32.partialorder %v2629_v22, 0.0 }
  0xaa   :  { %3754 = vst [vmem:[#allocation13_spill] sm:$0xff] %v2646_v10  ;;  %v659_v15 = vmax.f32 %v2646_v10, %v2652_v56  ;;  %vm312_vm1 = vcmp.gt.f32.partialorder %v2641_v62, 0.0  ;;  %v2667_v57 = vadd.f32 %v2370_v44, %v174_v54  ;;  %v435_v63 = vsel %vm307_vm8, %v2582_v27, %v371_v60 }
  0xab   :  { %v436_v51 = vsel %vm308_vm10, %v244_v20, %v372_v40  ;;  %v465_v55 = vsel %vm337_vm14, %v273_v31, %v401_v38  ;;  %v3757_v41 = vunpack.c.l.bf16 %v2376_v46  ;;  %v3758_v10 = vunpack.c.h.bf16 %v2376_v46 }
  0xac   :  { %v104_v4 = vpop.permute.xlu1 %103  ;;  %v99_v11 = vpop.permute.xlu0 %98  ;;  %660 = vmax.xlane.f32.xlu1 %v659_v15  ;;  %v466_v54 = vsel %vm338_vm15, %v274_v48, %v402_v5  ;;  %v3759_v9 = vunpack.c.l.bf16 %v2381_v47  ;;  %vm309_vm2 = vcmp.gt.f32.partialorder %v245_v50, 0.0  ;;  %v373_v27 = vmul.f32 0.2, %v245_v50 }
  0xad   :  { %v2676_v56 = vadd.f32 %v3757_v41, %v435_v63  ;;  %v2680_v23 = vadd.f32 %v3758_v10, %v436_v51  ;;  %v374_v20 = vmul.f32 0.2, %v246_v61  ;;  %v3760_v31 = vunpack.c.h.bf16 %v2381_v47 }
  0xae   :  { %v2685_v14 = vadd.f32 %v3759_v9, %v465_v55  ;;  %v277_v15 = vadd.f32 %v2368_v43, %v169_v45  ;;  %v467_v5 = vsel %vm339_vm12, %v2604_v39, %v403_v30  ;;  %v468_v10 = vsel %vm340_vm13, %v2607_v49, %v404_v32 }
  0xaf   :  { %v2689_v60 = vadd.f32 %v3760_v31, %v466_v54  ;;  %v662_v46 = vmax.f32 %v2676_v56, %v2680_v23  ;;  %v376_v48 = vmul.f32 0.2, %v2641_v62  ;;  %vm310_vm3 = vcmp.gt.f32.partialorder %v246_v61, 0.0 }
  0xb0   :  { %v184_v40 = vpop.permute.xlu1 %183  ;;  %v179_v38 = vpop.permute.xlu0 %178  ;;  %v278_v47 = vadd.f32 %v2370_v44, %v169_v45  ;;  %vm343_vm4 = vcmp.gt.f32.partialorder %v2662_v42, 0.0  ;;  %vm344_vm5 = vcmp.gt.f32.partialorder %v2667_v57, 0.0  ;;  %v2707_v63 = vadd.f32 %v2368_v43, %v104_v4 }
  0xb1   :  { %3761 = vst [vmem:[#allocation15_spill] sm:$0xff] %v2689_v60  ;;  %v707_v9 = vmax.f32 %v2685_v14, %v2689_v60  ;;  %663 = vmax.xlane.f32.xlu0 %v662_v46  ;;  %v2710_v39 = vadd.f32 %v2370_v44, %v104_v4  ;;  %v249_v49 = vadd.f32 %v2368_v43, %v99_v11  ;;  %v3762_v30 = vunpack.c.l.bf16 %v2390_v52 }
  0xb2   :  { %v3763_v32 = vunpack.c.h.bf16 %v2390_v52  ;;  %v437_v55 = vsel %vm309_vm2, %v245_v50, %v373_v27  ;;  %v407_v54 = vmul.f32 0.2, %v2662_v42  ;;  %v405_v31 = vmul.f32 0.2, %v277_v15 }
  0xb3   :  { %708 = vmax.xlane.f32.xlu1 %v707_v9  ;;  %v2715_v45 = vadd.f32 %v3762_v30, %v467_v5  ;;  %v438_v4 = vsel %vm310_vm3, %v246_v61, %v374_v20  ;;  %v3765_v46 = vunpack.c.l.bf16 %v2395_v53  ;;  %vm341_vm6 = vcmp.gt.f32.partialorder %v277_v15, 0.0 }
  0xb4   :  { %v2719_v51 = vadd.f32 %v3763_v32, %v468_v10  ;;  %v114_v41 = vpop.permute.xlu1 %113  ;;  %v109_v60 = vpop.permute.xlu0 %108  ;;  %v406_v5 = vmul.f32 0.2, %v278_v47  ;;  %v3767_v10 = vunpack.c.h.bf16 %v2395_v53  ;;  %v408_v50 = vmul.f32 0.2, %v2667_v57 }
  0xb5   :  { %v2726_v9 = vadd.f32 %v3765_v46, %v437_v55  ;;  %vm342_vm7 = vcmp.gt.f32.partialorder %v278_v47, 0.0  ;;  %v2736_v27 = vmul.f32 0.2, %v2707_v63  ;;  %v250_v61 = vadd.f32 %v2370_v44, %v99_v11 }
  0xb6   :  { %3764 = vst [vmem:[#allocation16_spill] sm:$0xff] %v2719_v51  ;;  %v710_v52 = vmax.f32 %v2715_v45, %v2719_v51  ;;  %v2732_v30 = vadd.f32 %v3767_v10, %v438_v4  ;;  %v2740_v20 = vmul.f32 0.2, %v2710_v39  ;;  %vm313_vm8 = vcmp.gt.f32.partialorder %v249_v49, 0.0 }
  0xb7   :  { %3766 = vst [vmem:[#allocation17_spill] sm:$0xff] %v2726_v9  ;;  %v2745_v53 = vadd.f32 %v2368_v43, %v184_v40  ;;  %vm315_vm9 = vcmp.gt.f32.partialorder %v2707_v63, 0.0  ;;  %vm316_vm10 = vcmp.gt.f32.partialorder %v2710_v39, 0.0  ;;  %v2750_v55 = vadd.f32 %v2370_v44, %v184_v40 }
  0xb8   :  { %3768 = vst [vmem:[#allocation18_spill] sm:$0xff] %v2732_v30  ;;  %711 = vmax.xlane.f32.xlu0 %v710_v52  ;;  %v665_v32 = vmax.f32 %v2726_v9, %v2732_v30  ;;  %v439_v11 = vsel %vm311_vm0, %v2629_v22, %v375_v33  ;;  %v440_v4 = vsel %vm312_vm1, %v2641_v62, %v376_v48  ;;  %v3769_v52 = vunpack.c.l.bf16 %v2404_v58  ;;  %v194_v33 = vpop.permute.xlu1 %193 }
  0xb9   :  { %v469_v46 = vsel %vm341_vm6, %v277_v15, %v405_v31  ;;  %v3770_v30 = vunpack.c.h.bf16 %v2404_v58  ;;  %v470_v40 = vsel %vm342_vm7, %v278_v47, %v406_v5  ;;  %v3771_v51 = vunpack.c.l.bf16 %v2409_v59 }
  0xba   :  { %666 = vmax.xlane.f32.xlu1 %v665_v32  ;;  %v2761_v10 = vadd.f32 %v3769_v52, %v439_v11  ;;  %vm314_vm11 = vcmp.gt.f32.partialorder %v250_v61, 0.0  ;;  %v377_v62 = vmul.f32 0.2, %v249_v49  ;;  %v378_v48 = vmul.f32 0.2, %v250_v61  ;;  %v189_v32 = vpop.permute.xlu0 %188 }
  0xbb   :  { %v2765_v9 = vadd.f32 %v3770_v30, %v440_v4  ;;  %v2770_v22 = vadd.f32 %v3771_v51, %v469_v46  ;;  %v3773_v15 = vunpack.c.h.bf16 %v2409_v59  ;;  %v281_v11 = vadd.f32 %v2368_v43, %v179_v38 }
  0xbc   :  { %v471_v47 = vsel %vm343_vm4, %v2662_v42, %v407_v54  ;;  %v472_v51 = vsel %vm344_vm5, %v2667_v57, %v408_v50  ;;  %vm347_vm12 = vcmp.gt.f32.partialorder %v2745_v53, 0.0  ;;  %vm348_vm13 = vcmp.gt.f32.partialorder %v2750_v55, 0.0 }
  0xbd   :  { %3772 = vst [vmem:[#allocation19_spill] sm:$0xff] %v2770_v22  ;;  %v2774_v31 = vadd.f32 %v3773_v15, %v470_v40  ;;  %v668_v58 = vmax.f32 %v2761_v10, %v2765_v9  ;;  %v282_v59 = vadd.f32 %v2370_v44, %v179_v38  ;;  %v411_v30 = vmul.f32 0.2, %v2745_v53 }
  0xbe   :  { %v2792_v4 = vadd.f32 %v2368_v43, %v114_v41  ;;  %v2795_v42 = vadd.f32 %v2370_v44, %v114_v41  ;;  %v253_v57 = vadd.f32 %v2368_v43, %v109_v60  ;;  %v254_v54 = vadd.f32 %v2370_v44, %v109_v60  ;;  %v124_v60 = vpop.permute.xlu1 %123 }
  0xbf   :  { %3774 = vst [vmem:[#allocation20_spill] sm:$0xff] %v2774_v31  ;;  %v713_v5 = vmax.f32 %v2770_v22, %v2774_v31  ;;  %669 = vmax.xlane.f32.xlu0 %v668_v58  ;;  %v3775_v50 = vunpack.c.l.bf16 %v2418_v0  ;;  %v3776_v46 = vunpack.c.h.bf16 %v2418_v0  ;;  %v441_v40 = vsel %vm313_vm8, %v249_v49, %v377_v62  ;;  %v119_v49 = vpop.permute.xlu0 %118 }
  0xc0   :  { %v412_v15 = vmul.f32 0.2, %v2750_v55  ;;  %v409_v58 = vmul.f32 0.2, %v281_v11  ;;  %v442_v41 = vsel %vm314_vm11, %v250_v61, %v378_v48  ;;  %v3778_v31 = vunpack.c.l.bf16 %v2423_v1 }
  0xc1   :  { %714 = vmax.xlane.f32.xlu1 %v713_v5  ;;  %v2801_v38 = vadd.f32 %v3775_v50, %v471_v47  ;;  %v2805_v52 = vadd.f32 %v3776_v46, %v472_v51  ;;  %vm345_vm14 = vcmp.gt.f32.partialorder %v281_v11, 0.0  ;;  %v410_v22 = vmul.f32 0.2, %v282_v59 }
  0xc2   :  { %v2812_v5 = vadd.f32 %v3778_v31, %v441_v40  ;;  %v3780_v0 = vunpack.c.h.bf16 %v2423_v1  ;;  %vm346_vm15 = vcmp.gt.f32.partialorder %v282_v59, 0.0  ;;  %v2821_v62 = vmul.f32 0.2, %v2792_v4 }
  0xc3   :  { %3777 = vst [vmem:[#allocation21_spill] sm:$0xff] %v2805_v52  ;;  %v716_v47 = vmax.f32 %v2801_v38, %v2805_v52  ;;  %v2824_v61 = vmul.f32 0.2, %v2795_v42  ;;  %vm317_vm0 = vcmp.gt.f32.partialorder %v253_v57, 0.0  ;;  %vm318_vm1 = vcmp.gt.f32.partialorder %v254_v54, 0.0 }
  0xc4   :  { %3779 = vst [vmem:[#allocation22_spill] sm:$0xff] %v2812_v5  ;;  %v2818_v51 = vadd.f32 %v3780_v0, %v442_v41  ;;  %v381_v48 = vmul.f32 0.2, %v253_v57  ;;  %v2829_v50 = vadd.f32 %v2368_v43, %v194_v33  ;;  %vm319_vm2 = vcmp.gt.f32.partialorder %v2792_v4, 0.0 }
  0xc5   :  { %717 = vmax.xlane.f32.xlu0 %v716_v47  ;;  %vm320_vm3 = vcmp.gt.f32.partialorder %v2795_v42, 0.0  ;;  %v2834_v1 = vadd.f32 %v2370_v44, %v194_v33  ;;  %v443_v46 = vsel %vm315_vm9, %v2707_v63, %v2736_v27  ;;  %v444_v40 = vsel %vm316_vm10, %v2710_v39, %v2740_v20 }
  0xc6   :  { %3781 = vst [vmem:[#allocation23_spill] sm:$0xff] %v2818_v51  ;;  %v671_v31 = vmax.f32 %v2812_v5, %v2818_v51  ;;  %v473_v41 = vsel %vm345_vm14, %v281_v11, %v409_v58  ;;  %v3782_v47 = vunpack.c.l.bf16 %v2432_v6  ;;  %v3783_v33 = vunpack.c.h.bf16 %v2432_v6 }
  0xc7   :  { %v474_v5 = vsel %vm346_vm15, %v282_v59, %v410_v22  ;;  %v3784_v63 = vunpack.c.l.bf16 %v2437_v7  ;;  %v382_v52 = vmul.f32 0.2, %v254_v54  ;;  %v285_v39 = vadd.f32 %v2368_v43, %v189_v32 }
  0xc8   :  { %672 = vmax.xlane.f32.xlu1 %v671_v31  ;;  %v2847_v0 = vadd.f32 %v3782_v47, %v443_v46  ;;  %v2851_v51 = vadd.f32 %v3783_v33, %v444_v40  ;;  %v286_v20 = vadd.f32 %v2370_v44, %v189_v32  ;;  %v3785_v11 = vunpack.c.h.bf16 %v2437_v7  ;;  %v204_v31 = vpop.permute.xlu1 %203  ;;  %v199_v46 = vpop.permute.xlu0 %198 }
  0xc9   :  { %v2856_v27 = vadd.f32 %v3784_v63, %v473_v41  ;;  %vm351_vm4 = vcmp.gt.f32.partialorder %v2829_v50, 0.0  ;;  %v475_v22 = vsel %vm347_vm12, %v2745_v53, %v411_v30  ;;  %v476_v59 = vsel %vm348_vm13, %v2750_v55, %v412_v15 }
  0xca   :  { %v2862_v58 = vadd.f32 %v3785_v11, %v474_v5  ;;  %v674_v6 = vmax.f32 %v2847_v0, %v2851_v51  ;;  %vm352_vm5 = vcmp.gt.f32.partialorder %v2834_v1, 0.0  ;;  %v415_v7 = vmul.f32 0.2, %v2829_v50 }
  0xcb   :  { %v2878_v5 = vadd.f32 %v2368_v43, %v124_v60  ;;  %v416_v40 = vmul.f32 0.2, %v2834_v1  ;;  %v2882_v53 = vadd.f32 %v2370_v44, %v124_v60  ;;  %v2885_v30 = vadd.f32 %v2368_v43, %v119_v49 }
  0xcc   :  { %3786 = vst [vmem:[#allocation24_spill] sm:$0xff] %v2862_v58  ;;  %v719_v32 = vmax.f32 %v2856_v27, %v2862_v58  ;;  %675 = vmax.xlane.f32.xlu0 %v674_v6  ;;  %v2888_v55 = vadd.f32 %v2370_v44, %v119_v49  ;;  %vm349_vm6 = vcmp.gt.f32.partialorder %v285_v39, 0.0  ;;  %v3787_v15 = vunpack.c.l.bf16 %v2446_v12 }
  0xcd   :  { %v3789_v47 = vunpack.c.h.bf16 %v2446_v12  ;;  %v445_v63 = vsel %vm317_vm0, %v253_v57, %v381_v48  ;;  %vm350_vm7 = vcmp.gt.f32.partialorder %v286_v20, 0.0  ;;  %v413_v60 = vmul.f32 0.2, %v285_v39  ;;  %v134_v57 = vpop.permute.xlu1 %133 }
  0xce   :  { %720 = vmax.xlane.f32.xlu1 %v719_v32  ;;  %v2892_v41 = vadd.f32 %v3787_v15, %v475_v22  ;;  %v446_v11 = vsel %vm318_vm1, %v254_v54, %v382_v52  ;;  %v3791_v6 = vunpack.c.l.bf16 %v2451_v13  ;;  %v414_v58 = vmul.f32 0.2, %v286_v20  ;;  %v129_v52 = vpop.permute.xlu0 %128 }
  0xcf   :  { %v2896_v33 = vadd.f32 %v3789_v47, %v476_v59  ;;  %v2905_v32 = vmul.f32 0.2, %v2878_v5  ;;  %v3793_v12 = vunpack.c.h.bf16 %v2451_v13  ;;  %v2914_v48 = vmul.f32 0.2, %v2882_v53 }
  0xd0   :  { %3788 = vst [vmem:[#allocation25_spill] sm:$0xff] %v2892_v41  ;;  %v2902_v49 = vadd.f32 %v3791_v6, %v445_v63  ;;  %vm321_vm8 = vcmp.gt.f32.partialorder %v2885_v30, 0.0  ;;  %vm322_vm9 = vcmp.gt.f32.partialorder %v2888_v55, 0.0  ;;  %v2919_v54 = vadd.f32 %v2368_v43, %v204_v31 }
  0xd1   :  { %3790 = vst [vmem:[#allocation26_spill] sm:$0xff] %v2896_v33  ;;  %v722_v22 = vmax.f32 %v2892_v41, %v2896_v33  ;;  %v2911_v59 = vadd.f32 %v3793_v12, %v446_v11  ;;  %v385_v15 = vmul.f32 0.2, %v2885_v30  ;;  %v2925_v47 = vadd.f32 %v2370_v44, %v204_v31 }
  0xd2   :  { %3792 = vst [vmem:[#allocation27_spill] sm:$0xff] %v2902_v49  ;;  %v2928_v63 = vadd.f32 %v2368_v43, %v199_v46  ;;  %vm323_vm10 = vcmp.gt.f32.partialorder %v2878_v5, 0.0  ;;  %vm324_vm11 = vcmp.gt.f32.partialorder %v2882_v53, 0.0  ;;  %v2933_v11 = vadd.f32 %v2370_v44, %v199_v46 }
  0xd3   :  { %3794 = vst [vmem:[#allocation28_spill] sm:$0xff] %v2911_v59  ;;  %723 = vmax.xlane.f32.xlu0 %v722_v22  ;;  %v677_v13 = vmax.f32 %v2902_v49, %v2911_v59  ;;  %v447_v6 = vsel %vm319_vm2, %v2792_v4, %v2821_v62  ;;  %v448_v31 = vsel %vm320_vm3, %v2795_v42, %v2824_v61  ;;  %v3795_v12 = vunpack.c.l.bf16 %v2460_v18 }
  0xd4   :  { %v477_v22 = vsel %vm349_vm6, %v285_v39, %v413_v60  ;;  %v3796_v46 = vunpack.c.h.bf16 %v2460_v18  ;;  %v478_v33 = vsel %vm350_vm7, %v286_v20, %v414_v58  ;;  %v3797_v4 = vunpack.c.l.bf16 %v2465_v19 }
  0xd5   :  { %678 = vmax.xlane.f32.xlu1 %v677_v13  ;;  %v2946_v59 = vadd.f32 %v3795_v12, %v447_v6  ;;  %v386_v41 = vmul.f32 0.2, %v2888_v55  ;;  %v2959_v42 = vmul.f32 0.2, %v2919_v54  ;;  %v3798_v61 = vunpack.c.h.bf16 %v2465_v19 }
  0xd6   :  { %v2950_v49 = vadd.f32 %v3796_v46, %v448_v31  ;;  %v2955_v62 = vadd.f32 %v3797_v4, %v477_v22  ;;  %v2966_v60 = vadd.f32 %v2368_v43, %v134_v57  ;;  %vm355_vm12 = vcmp.gt.f32.partialorder %v2919_v54, 0.0  ;;  %v209_v31 = vpop.permute.xlu0 %208 }
  0xd7   :  { %v2963_v39 = vadd.f32 %v3798_v61, %v478_v33  ;;  %vm356_vm13 = vcmp.gt.f32.partialorder %v2925_v47, 0.0  ;;  %v420_v18 = vmul.f32 0.2, %v2925_v47  ;;  %v479_v58 = vsel %vm351_vm4, %v2829_v50, %v415_v7  ;;  %v214_v33 = vpop.permute.xlu1 %213 }
  0xd8   :  { %v680_v20 = vmax.f32 %v2946_v59, %v2950_v49  ;;  %v480_v19 = vsel %vm352_vm5, %v2834_v1, %v416_v40  ;;  %vm353_vm14 = vcmp.gt.f32.partialorder %v2928_v63, 0.0  ;;  %vm354_vm15 = vcmp.gt.f32.partialorder %v2933_v11, 0.0 }
  0xd9   :  { %3799 = vst [vmem:[#allocation29_spill] sm:$0xff] %v2963_v39  ;;  %v417_v13 = vmul.f32 0.2, %v2928_v63  ;;  %v725_v6 = vmax.f32 %v2955_v62, %v2963_v39  ;;  %v418_v22 = vmul.f32 0.2, %v2933_v11  ;;  %v2986_v50 = vadd.f32 %v2370_v44, %v134_v57 }
  0xda   :  { %681 = vmax.xlane.f32.xlu0 %v680_v20  ;;  %v2989_v7 = vadd.f32 %v2368_v43, %v129_v52  ;;  %v2992_v1 = vadd.f32 %v2370_v44, %v129_v52  ;;  %v2995_v40 = vmul.f32 0.2, %v2966_v60  ;;  %v3800_v12 = vunpack.c.l.bf16 %v2474_v24 }
  0xdb   :  { %726 = vmax.xlane.f32.xlu1 %v725_v6  ;;  %v3802_v4 = vunpack.c.h.bf16 %v2474_v24  ;;  %v449_v57 = vsel %vm321_vm8, %v2885_v30, %v385_v15  ;;  %v450_v52 = vsel %vm322_vm9, %v2888_v55, %v386_v41  ;;  %v3804_v20 = vunpack.c.l.bf16 %v2479_v25 }
  0xdc   :  { %v2999_v46 = vadd.f32 %v3800_v12, %v479_v58  ;;  %v3016_v39 = vadd.f32 %v2368_v43, %v214_v33  ;;  %v3019_v58 = vadd.f32 %v2370_v44, %v214_v33  ;;  %v3028_v15 = vadd.f32 %v2368_v43, %v209_v31  ;;  %v144_v12 = vpop.permute.xlu1 %143 }
  0xdd   :  { %v3003_v61 = vadd.f32 %v3802_v4, %v480_v19  ;;  %v3013_v6 = vadd.f32 %v3804_v20, %v449_v57  ;;  %v3806_v19 = vunpack.c.h.bf16 %v2479_v25  ;;  %v3031_v55 = vadd.f32 %v2370_v44, %v209_v31 }
  0xde   :  { %3801 = vst [vmem:[#allocation30_spill] sm:$0xff] %v2999_v46  ;;  %v3034_v41 = vmul.f32 0.2, %v2986_v50  ;;  %vm325_vm0 = vcmp.gt.f32.partialorder %v2989_v7, 0.0  ;;  %vm326_vm1 = vcmp.gt.f32.partialorder %v2992_v1, 0.0  ;;  %vm327_vm2 = vcmp.gt.f32.partialorder %v2966_v60, 0.0 }
  0xdf   :  { %3803 = vst [vmem:[#allocation31_spill] sm:$0xff] %v3003_v61  ;;  %3805 = vst [vmem:[#allocation32_spill] sm:$0xff] %v3013_v6  ;;  %v728_v24 = vmax.f32 %v2999_v46, %v3003_v61  ;;  %v3025_v30 = vadd.f32 %v3806_v19, %v450_v52  ;;  %v389_v33 = vmul.f32 0.2, %v2989_v7  ;;  %v390_v25 = vmul.f32 0.2, %v2992_v1  ;;  %v139_v52 = vpop.permute.xlu0 %138 }
  0xe0   :  { %v3043_v57 = vmul.f32 0.2, %v3016_v39  ;;  %v3046_v31 = vmul.f32 0.2, %v3019_v58  ;;  %vm328_vm3 = vcmp.gt.f32.partialorder %v2986_v50, 0.0  ;;  %vm357_vm4 = vcmp.gt.f32.partialorder %v3028_v15, 0.0 }
  0xe1   :  { %3807 = vst [vmem:[#allocation33_spill] sm:$0xff] %v3025_v30  ;;  %729 = vmax.xlane.f32.xlu0 %v728_v24  ;;  %v683_v4 = vmax.f32 %v3013_v6, %v3025_v30  ;;  %v451_v20 = vsel %vm323_vm10, %v2878_v5, %v2905_v32  ;;  %v452_v24 = vsel %vm324_vm11, %v2882_v53, %v2914_v48  ;;  %vm358_vm5 = vcmp.gt.f32.partialorder %v3031_v55, 0.0 }
  0xe2   :  { %v481_v19 = vsel %vm353_vm14, %v2928_v63, %v417_v13  ;;  %v3808_v30 = vunpack.c.l.bf16 %v2492_v34  ;;  %v3809_v61 = vunpack.c.h.bf16 %v2492_v34  ;;  %v482_v5 = vsel %vm354_vm15, %v2933_v11, %v418_v22 }
  0xe3   :  { %684 = vmax.xlane.f32.xlu1 %v683_v4  ;;  %v3811_v53 = vunpack.c.l.bf16 %v2497_v35  ;;  %vm359_vm6 = vcmp.gt.f32.partialorder %v3016_v39, 0.0  ;;  %vm360_vm7 = vcmp.gt.f32.partialorder %v3019_v58, 0.0  ;;  %v3813_v48 = vunpack.c.h.bf16 %v2497_v35 }
  0xe4   :  { %v3065_v6 = vadd.f32 %v3808_v30, %v451_v20  ;;  %v3069_v46 = vadd.f32 %v3809_v61, %v452_v24  ;;  %v3085_v34 = vadd.f32 %v2368_v43, %v144_v12  ;;  %v3088_v13 = vadd.f32 %v2370_v44, %v144_v12  ;;  %v224_v24 = vpop.permute.xlu1 %223 }
  0xe5   :  { %v3076_v32 = vadd.f32 %v3811_v53, %v481_v19  ;;  %v3082_v63 = vadd.f32 %v3813_v48, %v482_v5  ;;  %v265_v11 = vadd.f32 %v2368_v43, %v139_v52  ;;  %v266_v61 = vadd.f32 %v2370_v44, %v139_v52 }
  0xe6   :  { %3810 = vst [vmem:[#allocation34_spill] sm:$0xff] %v3069_v46  ;;  %v686_v22 = vmax.f32 %v3065_v6, %v3069_v46  ;;  %v483_v35 = vsel %vm355_vm12, %v2919_v54, %v2959_v42  ;;  %v484_v30 = vsel %vm356_vm13, %v2925_v47, %v420_v18  ;;  %v421_v4 = vmul.f32 0.2, %v3028_v15  ;;  %v219_v47 = vpop.permute.xlu0 %218 }
  0xe7   :  { %3812 = vst [vmem:[#allocation35_spill] sm:$0xff] %v3076_v32  ;;  %3814 = vst [vmem:[#allocation36_spill] sm:$0xff] %v3082_v63  ;;  %v422_v12 = vmul.f32 0.2, %v3031_v55  ;;  %v731_v20 = vmax.f32 %v3076_v32, %v3082_v63  ;;  %vm331_vm8 = vcmp.gt.f32.partialorder %v3085_v34, 0.0  ;;  %vm332_vm9 = vcmp.gt.f32.partialorder %v3088_v13, 0.0 }
  0xe8   :  { %687 = vmax.xlane.f32.xlu0 %v686_v22  ;;  %v395_v52 = vmul.f32 0.2, %v3085_v34  ;;  %v396_v54 = vmul.f32 0.2, %v3088_v13  ;;  %vm329_vm10 = vcmp.gt.f32.partialorder %v265_v11, 0.0  ;;  %vm330_vm11 = vcmp.gt.f32.partialorder %v266_v61, 0.0 }
  0xe9   :  { %732 = vmax.xlane.f32.xlu1 %v731_v20  ;;  %v393_v42 = vmul.f32 0.2, %v265_v11  ;;  %v3815_v18 = vunpack.c.l.bf16 %v2506_v29  ;;  %v3816_v5 = vunpack.c.h.bf16 %v2506_v29  ;;  %v453_v48 = vsel %vm325_vm0, %v2989_v7, %v389_v33  ;;  %v524_v22 = vld [vmem:[%s3700_s3 + $0xf8] sm:$0xff]  ;;  %s2204_s3 = smov [#allocation5]  }
  0xea   :  { %v454_v20 = vsel %vm326_vm1, %v2992_v1, %v390_v25  ;;  %v3818_v63 = vunpack.c.l.bf16 %v2511_v28  ;;  %v299_v29 = vadd.f32 %v2368_v43, %v224_v24  ;;  %v3819_v7 = vunpack.c.h.bf16 %v2511_v28  ;;  %s1683_s19 = sshll.u32 %s2204_s3, 4  ;;  %s1684_s19 = int_to_ptr.vmem [resolvable:$true] %s1683_s19 }
  0xeb   :  { %v3111_v19 = vadd.f32 %v3815_v18, %v483_v35  ;;  %v3115_v53 = vadd.f32 %v3816_v5, %v484_v30  ;;  %v300_v30 = vadd.f32 %v2370_v44, %v224_v24  ;;  %v297_v5 = vadd.f32 %v2368_v43, %v219_v47  ;;  %s2174_s20 = scalar_lea.vmem %s1684_s19, 4096  ;;  %p2179_p9 = scmp.lt.s32.totalorder %s1684_s19, %s1684_s19 }
  0xec   :  { %v3128_v35 = vadd.f32 %v3818_v63, %v453_v48  ;;  %v3136_v33 = vadd.f32 %v3819_v7, %v454_v20  ;;  %v298_v32 = vadd.f32 %v2370_v44, %v219_v47  ;;  %v394_v1 = vmul.f32 0.2, %v266_v61  ;;  %p2175_p8 = scmp.ne.s32.totalorder %s1684_s19, %s2174_s20  ;;  %p2180_p10 = scmp.lt.s32.totalorder %s2174_s20, %s2174_s20 }
  0xed   :  { %3817 = vst [vmem:[#allocation37_spill] sm:$0xff] %v3115_v53  ;;  %v734_v18 = vmax.f32 %v3111_v19, %v3115_v53  ;;  %v427_v25 = vmul.f32 0.2, %v299_v29  ;;  %v428_v46 = vmul.f32 0.2, %v300_v30  ;;  %v587_v63 = vunpack.c.l.bf16 %v524_v22 }
  0xee   :  { %v689_v48 = vmax.f32 %v3128_v35, %v3136_v33  ;;  %vm361_vm12 = vcmp.gt.f32.partialorder %v297_v5, 0.0  ;;  %vm362_vm13 = vcmp.gt.f32.partialorder %v298_v32, 0.0  ;;  %v425_v24 = vmul.f32 0.2, %v297_v5  ;;  %p2181_p11 = por %p2180_p10, %p2179_p9 }
  0xef   :  { %735 = vmax.xlane.f32.xlu0 %v734_v18  ;;  %v426_v53 = vmul.f32 0.2, %v298_v32  ;;  %v455_v28 = vsel %vm327_vm2, %v2966_v60, %v2995_v40  ;;  %v456_v43 = vsel %vm328_vm3, %v2986_v50, %v3034_v41  ;;  %v485_v44 = vsel %vm357_vm4, %v3028_v15, %v421_v4 }
  0xf0   :  { %690 = vmax.xlane.f32.xlu1 %v689_v48  ;;  %v3820_v47 = vunpack.c.l.bf16 %v2524_v21  ;;  %v3821_v18 = vunpack.c.h.bf16 %v2524_v21  ;;  %v486_v60 = vsel %vm358_vm5, %v3031_v55, %v422_v12  ;;  %v3822_v40 = vunpack.c.l.bf16 %v2533_v26  ;;  %p2182_p12 = pnand %p2181_p11, %p2175_p8 }
  0xf1   :  { %v3823_v41 = vunpack.c.h.bf16 %v2533_v26  ;;  %v487_v4 = vsel %vm359_vm6, %v3016_v39, %v3043_v57  ;;  %v488_v21 = vsel %vm360_vm7, %v3019_v58, %v3046_v31  ;;  %v457_v55 = vsel %vm329_vm10, %v265_v11, %v393_v42 }
  0xf2   :  { %v3155_v20 = vadd.f32 %v3820_v47, %v455_v28  ;;  %v3159_v7 = vadd.f32 %v3821_v18, %v456_v43  ;;  %v3166_v50 = vadd.f32 %v3822_v40, %v485_v44  ;;  %v3824_v48 = vunpack.c.l.bf16 %v2540_v37 }
  0xf3   :  { %v3170_v15 = vadd.f32 %v3823_v41, %v486_v60  ;;  %v3825_v28 = vunpack.c.h.bf16 %v2540_v37  ;;  %v458_v39 = vsel %vm330_vm11, %v266_v61, %v394_v1  ;;  %v3826_v58 = vunpack.c.l.bf16 %v2545_v17 }
  0xf4   :  { %v692_v12 = vmax.f32 %v3155_v20, %v3159_v7  ;;  %v3185_v26 = vadd.f32 %v3824_v48, %v487_v4  ;;  %v3827_v11 = vunpack.c.h.bf16 %v2545_v17  ;;  %v459_v44 = vsel %vm331_vm8, %v3085_v34, %v395_v52 }
  0xf5   :  { %v3189_v43 = vadd.f32 %v3825_v28, %v488_v21  ;;  %v737_v57 = vmax.f32 %v3166_v50, %v3170_v15  ;;  %v3196_v31 = vadd.f32 %v3826_v58, %v457_v55  ;;  %vm363_vm14 = vcmp.gt.f32.partialorder %v299_v29, 0.0 }
  0xf6   :  { %v3200_v42 = vadd.f32 %v3827_v11, %v458_v39  ;;  %vm364_vm15 = vcmp.gt.f32.partialorder %v300_v30, 0.0  ;;  %693 = vmax.xlane.f32.xlu0 %v692_v12  ;;  %v460_v37 = vsel %vm332_vm9, %v3088_v13, %v396_v54  ;;  %v489_v61 = vsel %vm361_vm12, %v297_v5, %v425_v24  ;;  %v3832_v11 = vld [vmem:[#allocation8_spill] sm:$0xff] }
  0xf7   :  { %738 = vmax.xlane.f32.xlu1 %v737_v57  ;;  %v490_v17 = vsel %vm362_vm13, %v298_v32, %v426_v53  ;;  %v3828_v47 = vunpack.c.l.bf16 %v2569_v2  ;;  %v588_v34 = vunpack.c.h.bf16 %v524_v22  ;;  %v740_v52 = vmax.f32 %v3185_v26, %v3189_v43 }
  0xf8   :  { %v695_v1 = vmax.f32 %v3196_v31, %v3200_v42  ;;  %v3829_v60 = vunpack.c.l.bf16 %v2560_v16  ;;  %v3830_v13 = vunpack.c.h.bf16 %v2560_v16  ;;  %v3831_v5 = vunpack.c.h.bf16 %v2569_v2  ;;  %v1880_v16 = vld [vmem:[#allocation2 + $0x40] sm:$0xff]  }
  0xf9   :  { %v3214_v18 = vadd.f32 %v3828_v47, %v489_v61  ;;  %v491_v32 = vsel %vm363_vm14, %v299_v29, %v427_v25  ;;  %v492_v53 = vsel %vm364_vm15, %v300_v30, %v428_v46  ;;  %v1881_v46 = vld [vmem:[#allocation2] sm:$0xff]   ;;  %v1882_v29 = vld [vmem:[#allocation2 + $0x48] sm:$0xff]   ;;  %1743 = vmatprep.subr.bf16.mxu0 %v1880_v16  ;;  %1855 = vmatprep.subr.bf16.mxu1 %v1880_v16  ;;  %v1884_v25 = vld [vmem:[#allocation2 + $0x50] sm:$0xff]  }
  0xfa   :  { %v3220_v40 = vadd.f32 %v3829_v60, %v459_v44  ;;  %v3224_v54 = vadd.f32 %v3830_v13, %v460_v37  ;;  %v3228_v24 = vadd.f32 %v3831_v5, %v490_v17  ;;  %741 = vmax.xlane.f32.xlu0 %v740_v52  ;;  %v3234_v4 = vadd.f32 %v587_v63, %v491_v32  ;;  %v1883_v30 = vld [vmem:[#allocation2 + $0x8] sm:$0xff]   ;;  %v1885_v63 = vld [vmem:[#allocation2 + $0x10] sm:$0xff]   ;;  %v3835_v13 = vld [vmem:[#allocation11_spill] sm:$0xff] }
  0xfb   :  { %696 = vmax.xlane.f32.xlu1 %v695_v1  ;;  %v3236_v21 = vadd.f32 %v588_v34, %v492_v53  ;;  %1744 = vmatpush3.bf16.msra.mxu0 %v1881_v46  ;;  %v3833_v61 = vld [vmem:[#allocation9_spill] sm:$0xff]  ;;  %v3834_v17 = vld [vmem:[#allocation10_spill] sm:$0xff]  ;;  %v3836_v32 = vld [vmem:[#allocation12_spill] sm:$0xff] }
  0xfc   :  { %v743_v22 = vmax.f32 %v3214_v18, %v3228_v24  ;;  %v698_v41 = vmax.f32 %v3220_v40, %v3224_v54  ;;  %1863 = vmatpush3.bf16.msra.mxu1 %v1881_v46  ;;  %1745 = vmatprep.subr.bf16.mxu0 %v1882_v29 }
  0xfd   :  { %v746_v2 = vmax.f32 %v3234_v4, %v3236_v21  ;;  %1856 = vmatprep.subr.bf16.mxu1 %v1882_v29 }
  0xfe   :  { %699 = vmax.xlane.f32.xlu0 %v698_v41 }
  0xff   :  { %744 = vmax.xlane.f32.xlu1 %v743_v22  ;;  %1746 = vmatpush3.bf16.msra.mxu0 %v1883_v30  ;;  %v3837_v22 = vld [vmem:[#allocation13_spill] sm:$0xff] }
 0x100   :  { %1864 = vmatpush3.bf16.msra.mxu1 %v1883_v30  ;;  %1747 = vmatprep.subr.bf16.mxu0 %v1884_v25 }
 0x101   :  { %1857 = vmatprep.subr.bf16.mxu1 %v1884_v25 }
 0x102   :  { %747 = vmax.xlane.f32.xlu0 %v746_v2  ;;  %v3838_v2 = vld [vmem:[#allocation14_spill] sm:$0xff] }
 0x103   :  { %1748 = vmatpush3.bf16.msra.mxu0 %v1885_v63 }
 0x104   :  { %1865 = vmatpush3.bf16.msra.mxu1 %v1885_v63 }
 0x12c   :  { %v655_v55 = vpop.xlane.xlu0 %654 }
 0x12d   :  { %v749_v12 = vsub.f32 %v2573_v3, %v655_v55  ;;  %v750_v48 = vsub.f32 %v2577_v8, %v655_v55 }
 0x12f   :  { %v813_v28 = vmul.f32 1.442695, %v749_v12  ;;  %v815_v39 = vmul.f32 1.442695, %v750_v48 }
 0x130   :  { %v703_v57 = vpop.xlane.xlu0 %702 }
 0x131   :  { %1896 = vpow2.f32 %v813_v28  ;;  %v781_v58 = vsub.f32 %v2591_v36, %v703_v57  ;;  %v782_v44 = vsub.f32 %v3832_v11, %v703_v57  ;;  %v3839_v11 = vld [vmem:[#allocation15_spill] sm:$0xff] }
 0x132   :  { %1898 = vpow2.f32 %v815_v39  ;;  %v658_v37 = vpop.xlane.xlu1 %657 }
 0x133   :  { %v751_v1 = vsub.f32 %v3833_v61, %v658_v37  ;;  %v752_v47 = vsub.f32 %v3834_v17, %v658_v37  ;;  %v877_v34 = vmul.f32 1.442695, %v781_v58  ;;  %v879_v52 = vmul.f32 1.442695, %v782_v44 }
 0x135   :  { %v817_v60 = vmul.f32 1.442695, %v751_v1  ;;  %v819_v3 = vmul.f32 1.442695, %v752_v47  ;;  %1900 = vpow2.f32 %v877_v34 }
 0x136   :  { %1902 = vpow2.f32 %v879_v52  ;;  %v706_v8 = vpop.xlane.xlu0 %705 }
 0x137   :  { %1904 = vpow2.f32 %v817_v60  ;;  %v783_v5 = vsub.f32 %v3835_v13, %v706_v8  ;;  %v784_v36 = vsub.f32 %v3836_v32, %v706_v8  ;;  %v3841_v32 = vld [vmem:[#allocation17_spill] sm:$0xff] }
 0x138   :  { %1906 = vpow2.f32 %v819_v3  ;;  %v3840_v3 = vld [vmem:[#allocation16_spill] sm:$0xff] }
 0x139   :  { %v661_v53 = vpop.xlane.xlu1 %660  ;;  %v881_v46 = vmul.f32 1.442695, %v783_v5  ;;  %v883_v29 = vmul.f32 1.442695, %v784_v36 }
 0x13a   :  { %v753_v41 = vsub.f32 %v3837_v22, %v661_v53  ;;  %v754_v16 = vsub.f32 %v3838_v2, %v661_v53  ;;  %v3842_v53 = vld [vmem:[#allocation18_spill] sm:$0xff] }
 0x13b   :  { %v3250_v30 = vpop.eup %1896  ;;  %1908 = vpow2.f32 %v881_v46 }
 0x13c   :  { %v821_v25 = vmul.f32 1.442695, %v753_v41  ;;  %v823_v63 = vmul.f32 1.442695, %v754_v16  ;;  %v3252_v55 = vpop.eup %1898  ;;  %1910 = vpow2.f32 %v883_v29 }
 0x13d   :  { %v941_v57 = vadd.f32 %v3252_v55, %v3250_v30 }
 0x13e   :  { %v664_v12 = vpop.xlane.xlu0 %663  ;;  %1912 = vpow2.f32 %v821_v25 }
 0x13f   :  { %v755_v28 = vsub.f32 %v2676_v56, %v664_v12  ;;  %v756_v39 = vsub.f32 %v2680_v23, %v664_v12  ;;  %1914 = vpow2.f32 %v823_v63  ;;  %v3260_v37 = vpop.eup %1900  ;;  %942 = vadd.xlane.f32.xlu1 %v941_v57 }
 0x140   :  { %v709_v48 = vpop.xlane.xlu1 %708  ;;  %v3262_v1 = vpop.eup %1902 }
 0x141   :  { %v785_v58 = vsub.f32 %v2685_v14, %v709_v48  ;;  %v786_v44 = vsub.f32 %v3839_v11, %v709_v48  ;;  %v825_v61 = vmul.f32 1.442695, %v755_v28  ;;  %v827_v34 = vmul.f32 1.442695, %v756_v39  ;;  %v3264_v56 = vpop.eup %1904 }
 0x142   :  { %v989_v52 = vadd.f32 %v3262_v1, %v3260_v37  ;;  %v3268_v60 = vpop.eup %1906 }
 0x143   :  { %v885_v17 = vmul.f32 1.442695, %v785_v58  ;;  %v887_v47 = vmul.f32 1.442695, %v786_v44  ;;  %1916 = vpow2.f32 %v825_v61  ;;  %v944_v5 = vadd.f32 %v3268_v60, %v3264_v56  ;;  %v3843_v58 = vld [vmem:[#allocation19_spill] sm:$0xff]  ;;  %v3844_v44 = vld [vmem:[#allocation20_spill] sm:$0xff] }
 0x144   :  { %990 = vadd.xlane.f32.xlu1 %v989_v52 }
 0x145   :  { %v712_v23 = vpop.xlane.xlu0 %711  ;;  %1918 = vpow2.f32 %v885_v17  ;;  %v3276_v2 = vpop.eup %1908  ;;  %945 = vadd.xlane.f32.xlu0 %v944_v5 }
 0x146   :  { %v787_v14 = vsub.f32 %v2715_v45, %v712_v23  ;;  %v788_v8 = vsub.f32 %v3840_v3, %v712_v23  ;;  %1920 = vpow2.f32 %v887_v47  ;;  %v3278_v46 = vpop.eup %1910 }
 0x147   :  { %v667_v13 = vpop.xlane.xlu1 %666  ;;  %1922 = vpow2.f32 %v827_v34  ;;  %v992_v12 = vadd.f32 %v3278_v46, %v3276_v2 }
 0x148   :  { %v757_v36 = vsub.f32 %v3841_v32, %v667_v13  ;;  %v758_v22 = vsub.f32 %v3842_v53, %v667_v13  ;;  %v889_v41 = vmul.f32 1.442695, %v787_v14  ;;  %v891_v16 = vmul.f32 1.442695, %v788_v8  ;;  %v3280_v25 = vpop.eup %1912  ;;  %v3845_v13 = vld [vmem:[#allocation21_spill] sm:$0xff]  ;;  %v1886_v32 = vld [vmem:[#allocation2 + $0x58] sm:$0xff]  }
 0x149   :  { %v3284_v48 = vpop.eup %1914  ;;  %993 = vadd.xlane.f32.xlu0 %v992_v12  ;;  %1749 = vmatprep.subr.bf16.mxu0 %v1886_v32 }
 0x14a   :  { %v829_v45 = vmul.f32 1.442695, %v757_v36  ;;  %v831_v29 = vmul.f32 1.442695, %v758_v22  ;;  %1924 = vpow2.f32 %v889_v41  ;;  %v947_v17 = vadd.f32 %v3284_v48, %v3280_v25  ;;  %v1887_v36 = vld [vmem:[#allocation2 + $0x18] sm:$0xff]   ;;  %1858 = vmatprep.subr.bf16.mxu1 %v1886_v32 }
 0x14b   :  { %1926 = vpow2.f32 %v891_v16  ;;  %v3846_v16 = vld [vmem:[#allocation22_spill] sm:$0xff]  ;;  %1750 = vmatpush3.bf16.msra.mxu0 %v1887_v36  ;;  %1866 = vmatpush3.bf16.msra.mxu1 %v1887_v36 }
 0x14c   :  { %v670_v63 = vpop.xlane.xlu0 %669  ;;  %1928 = vpow2.f32 %v829_v45  ;;  %948 = vadd.xlane.f32.xlu1 %v947_v17 }
 0x14d   :  { %v759_v39 = vsub.f32 %v2761_v10, %v670_v63  ;;  %v760_v57 = vsub.f32 %v2765_v9, %v670_v63  ;;  %1930 = vpow2.f32 %v831_v29  ;;  %v3292_v34 = vpop.eup %1916  ;;  %v3847_v29 = vld [vmem:[#allocation23_spill] sm:$0xff] }
 0x14e   :  { %v715_v28 = vpop.xlane.xlu1 %714 }
 0x14f   :  { %v789_v11 = vsub.f32 %v3843_v58, %v715_v28  ;;  %v790_v61 = vsub.f32 %v3844_v44, %v715_v28  ;;  %v833_v47 = vmul.f32 1.442695, %v759_v39  ;;  %v835_v14 = vmul.f32 1.442695, %v760_v57  ;;  %v3294_v3 = vpop.eup %1918 }
 0x150   :  { %v3296_v10 = vpop.eup %1920 }
 0x151   :  { %v893_v23 = vmul.f32 1.442695, %v789_v11  ;;  %v895_v52 = vmul.f32 1.442695, %v790_v61  ;;  %1932 = vpow2.f32 %v833_v47  ;;  %v3300_v53 = vpop.eup %1922  ;;  %v995_v41 = vadd.f32 %v3296_v10, %v3294_v3 }
 0x152   :  { %v718_v9 = vpop.xlane.xlu0 %717  ;;  %v950_v39 = vadd.f32 %v3300_v53, %v3292_v34 }
 0x153   :  { %1934 = vpow2.f32 %v893_v23  ;;  %v791_v8 = vsub.f32 %v2801_v38, %v718_v9  ;;  %v792_v5 = vsub.f32 %v3845_v13, %v718_v9  ;;  %996 = vadd.xlane.f32.xlu1 %v995_v41  ;;  %v1888_v9 = vld [vmem:[#allocation2 + $0x60] sm:$0xff]  }
 0x154   :  { %1936 = vpow2.f32 %v895_v52  ;;  %v3306_v38 = vpop.eup %1924  ;;  %951 = vadd.xlane.f32.xlu0 %v950_v39  ;;  %1751 = vmatprep.subr.bf16.mxu0 %v1888_v9 }
 0x155   :  { %v673_v22 = vpop.xlane.xlu1 %672  ;;  %1938 = vpow2.f32 %v835_v14  ;;  %v897_v12 = vmul.f32 1.442695, %v791_v8  ;;  %v899_v28 = vmul.f32 1.442695, %v792_v5  ;;  %v3310_v57 = vpop.eup %1926  ;;  %v1889_v8 = vld [vmem:[#allocation2 + $0x20] sm:$0xff]   ;;  %1859 = vmatprep.subr.bf16.mxu1 %v1888_v9 }
 0x156   :  { %v761_v45 = vsub.f32 %v3846_v16, %v673_v22  ;;  %v762_v63 = vsub.f32 %v3847_v29, %v673_v22  ;;  %v3312_v44 = vpop.eup %1928  ;;  %v998_v17 = vadd.f32 %v3310_v57, %v3306_v38  ;;  %v3848_v5 = vld [vmem:[#allocation24_spill] sm:$0xff]  ;;  %1752 = vmatpush3.bf16.msra.mxu0 %v1889_v8  ;;  %1867 = vmatpush3.bf16.msra.mxu1 %v1889_v8 }
 0x157   :  { %1940 = vpow2.f32 %v897_v12  ;;  %v3316_v47 = vpop.eup %1930  ;;  %v3852_v9 = vld [vmem:[#allocation28_spill] sm:$0xff] }
 0x158   :  { %v837_v58 = vmul.f32 1.442695, %v761_v45  ;;  %v839_v11 = vmul.f32 1.442695, %v762_v63  ;;  %1942 = vpow2.f32 %v899_v28  ;;  %v953_v36 = vadd.f32 %v3316_v47, %v3312_v44  ;;  %999 = vadd.xlane.f32.xlu0 %v998_v17  ;;  %v3849_v63 = vld [vmem:[#allocation25_spill] sm:$0xff]  ;;  %v3850_v28 = vld [vmem:[#allocation26_spill] sm:$0xff] }
 0x159   :  { %v676_v61 = vpop.xlane.xlu0 %675  ;;  %v1890_v17 = vld [vmem:[#allocation2 + $0x68] sm:$0xff]  }
 0x15a   :  { %1944 = vpow2.f32 %v837_v58  ;;  %v763_v52 = vsub.f32 %v2847_v0, %v676_v61  ;;  %v764_v14 = vsub.f32 %v2851_v51, %v676_v61  ;;  %954 = vadd.xlane.f32.xlu1 %v953_v36  ;;  %1753 = vmatprep.subr.bf16.mxu0 %v1890_v17 }
 0x15b   :  { %v721_v23 = vpop.xlane.xlu1 %720  ;;  %1946 = vpow2.f32 %v839_v11  ;;  %v3324_v41 = vpop.eup %1932  ;;  %1860 = vmatprep.subr.bf16.mxu1 %v1890_v17  ;;  %v3855_v17 = vld [vmem:[#allocation29_spill] sm:$0xff] }
 0x15c   :  { %v793_v13 = vsub.f32 %v2856_v27, %v721_v23  ;;  %v794_v32 = vsub.f32 %v3848_v5, %v721_v23  ;;  %v841_v22 = vmul.f32 1.442695, %v763_v52  ;;  %v843_v0 = vmul.f32 1.442695, %v764_v14  ;;  %v1891_v23 = vld [vmem:[#allocation2 + $0x28] sm:$0xff]   ;;  %v3851_v52 = vld [vmem:[#allocation27_spill] sm:$0xff] }
 0x15d   :  { %v3326_v51 = vpop.eup %1934  ;;  %1754 = vmatpush3.bf16.msra.mxu0 %v1891_v23  ;;  %1868 = vmatpush3.bf16.msra.mxu1 %v1891_v23 }
 0x15e   :  { %v901_v16 = vmul.f32 1.442695, %v793_v13  ;;  %v903_v45 = vmul.f32 1.442695, %v794_v32  ;;  %1948 = vpow2.f32 %v841_v22  ;;  %v3328_v27 = vpop.eup %1936 }
 0x15f   :  { %v3332_v58 = vpop.eup %1938  ;;  %v1001_v61 = vadd.f32 %v3328_v27, %v3326_v51 }
 0x160   :  { %v724_v29 = vpop.xlane.xlu0 %723  ;;  %1950 = vpow2.f32 %v901_v16  ;;  %v956_v36 = vadd.f32 %v3332_v58, %v3324_v41 }
 0x161   :  { %v795_v12 = vsub.f32 %v3849_v63, %v724_v29  ;;  %v796_v39 = vsub.f32 %v3850_v28, %v724_v29  ;;  %1952 = vpow2.f32 %v903_v45  ;;  %v3338_v5 = vpop.eup %1940  ;;  %1002 = vadd.xlane.f32.xlu1 %v1001_v61 }
 0x162   :  { %v679_v11 = vpop.xlane.xlu1 %678  ;;  %1954 = vpow2.f32 %v843_v0  ;;  %v3342_v22 = vpop.eup %1942  ;;  %957 = vadd.xlane.f32.xlu0 %v956_v36 }
 0x163   :  { %v765_v14 = vsub.f32 %v3851_v52, %v679_v11  ;;  %v766_v8 = vsub.f32 %v3852_v9, %v679_v11  ;;  %v905_v13 = vmul.f32 1.442695, %v795_v12  ;;  %v907_v32 = vmul.f32 1.442695, %v796_v39 }
 0x164   :  { %v3344_v0 = vpop.eup %1944  ;;  %v1004_v63 = vadd.f32 %v3342_v22, %v3338_v5 }
 0x165   :  { %v845_v16 = vmul.f32 1.442695, %v765_v14  ;;  %v847_v45 = vmul.f32 1.442695, %v766_v8  ;;  %1956 = vpow2.f32 %v905_v13  ;;  %3853 = vst [vmem:[#allocation8_spill] sm:$0xff] %v3344_v0  ;;  %v3348_v12 = vpop.eup %1946  ;;  %v1892_v8 = vld [vmem:[#allocation2 + $0x70] sm:$0xff]  }
 0x166   :  { %1958 = vpow2.f32 %v907_v32  ;;  %3854 = vst [vmem:[#allocation9_spill] sm:$0xff] %v3348_v12  ;;  %v959_v14 = vadd.f32 %v3348_v12, %v3344_v0  ;;  %v1893_v13 = vld [vmem:[#allocation2 + $0x30] sm:$0xff]   ;;  %1005 = vadd.xlane.f32.xlu0 %v1004_v63  ;;  %1755 = vmatprep.subr.bf16.mxu0 %v1892_v8  ;;  %v1895_v0 = vld [vmem:[#allocation2 + $0x38] sm:$0xff]  }
 0x167   :  { %v682_v29 = vpop.xlane.xlu0 %681  ;;  %1960 = vpow2.f32 %v845_v16  ;;  %1861 = vmatprep.subr.bf16.mxu1 %v1892_v8  ;;  %1756 = vmatpush3.bf16.msra.mxu0 %v1893_v13 }
 0x168   :  { %v727_v28 = vpop.xlane.xlu1 %726  ;;  %v767_v39 = vsub.f32 %v2946_v59, %v682_v29  ;;  %v768_v11 = vsub.f32 %v2950_v49, %v682_v29  ;;  %1962 = vpow2.f32 %v847_v45  ;;  %v3356_v23 = vpop.eup %1948  ;;  %960 = vadd.xlane.f32.xlu1 %v959_v14  ;;  %v3858_v45 = vld [vmem:[#allocation30_spill] sm:$0xff]  ;;  %1869 = vmatpush3.bf16.msra.mxu1 %v1893_v13  ;;  %v3861_v14 = vld [vmem:[#allocation33_spill] sm:$0xff] }
 0x169   :  { %v797_v61 = vsub.f32 %v2955_v62, %v727_v28  ;;  %v798_v52 = vsub.f32 %v3855_v17, %v727_v28  ;;  %v3859_v28 = vld [vmem:[#allocation31_spill] sm:$0xff]  ;;  %v3860_v17 = vld [vmem:[#allocation32_spill] sm:$0xff] }
 0x16a   :  { %v849_v9 = vmul.f32 1.442695, %v767_v39  ;;  %v851_v16 = vmul.f32 1.442695, %v768_v11  ;;  %v3358_v59 = vpop.eup %1950 }
 0x16b   :  { %v909_v32 = vmul.f32 1.442695, %v797_v61  ;;  %v911_v36 = vmul.f32 1.442695, %v798_v52  ;;  %3856 = vst [vmem:[#allocation10_spill] sm:$0xff] %v3358_v59  ;;  %v3360_v62 = vpop.eup %1952 }
 0x16c   :  { %1964 = vpow2.f32 %v849_v9  ;;  %3857 = vst [vmem:[#allocation11_spill] sm:$0xff] %v3360_v62  ;;  %v3364_v61 = vpop.eup %1954  ;;  %v1007_v63 = vadd.f32 %v3360_v62, %v3358_v59 }
 0x16d   :  { %1966 = vpow2.f32 %v909_v32  ;;  %v1894_v32 = vld [vmem:[#allocation2 + $0x78] sm:$0xff]   ;;  %v962_v13 = vadd.f32 %v3364_v61, %v3356_v23 }
 0x16e   :  { %v730_v49 = vpop.xlane.xlu0 %729  ;;  %1968 = vpow2.f32 %v911_v36  ;;  %1008 = vadd.xlane.f32.xlu1 %v1007_v63  ;;  %1757 = vmatprep.subr.bf16.mxu0 %v1894_v32 }
 0x16f   :  { %v799_v29 = vsub.f32 %v3858_v45, %v730_v49  ;;  %v800_v39 = vsub.f32 %v3859_v28, %v730_v49  ;;  %1970 = vpow2.f32 %v851_v16  ;;  %v3370_v45 = vpop.eup %1956  ;;  %1862 = vmatprep.subr.bf16.mxu1 %v1894_v32  ;;  %963 = vadd.xlane.f32.xlu0 %v962_v13  ;;  %v3866_v32 = vld [vmem:[#allocation36_spill] sm:$0xff] }
 0x170   :  { %v685_v11 = vpop.xlane.xlu1 %684  ;;  %3862 = vst [vmem:[#allocation12_spill] sm:$0xff] %v3370_v45  ;;  %v3374_v36 = vpop.eup %1958  ;;  %1758 = vmatpush3.bf16.msra.mxu0 %v1895_v0  ;;  %1870 = vmatpush3.bf16.msra.mxu1 %v1895_v0 }
 0x171   :  { %v769_v52 = vsub.f32 %v3860_v17, %v685_v11  ;;  %v770_v9 = vsub.f32 %v3861_v14, %v685_v11  ;;  %v913_v8 = vmul.f32 1.442695, %v799_v29  ;;  %v915_v49 = vmul.f32 1.442695, %v800_v39  ;;  %3863 = vst [vmem:[#allocation13_spill] sm:$0xff] %v3374_v36  ;;  %v3376_v16 = vpop.eup %1960 }
 0x172   :  { %v1010_v11 = vadd.f32 %v3374_v36, %v3370_v45  ;;  %v3380_v39 = vpop.eup %1962 }
 0x173   :  { %v853_v28 = vmul.f32 1.442695, %v769_v52  ;;  %v855_v12 = vmul.f32 1.442695, %v770_v9  ;;  %1972 = vpow2.f32 %v913_v8  ;;  %v3864_v52 = vld [vmem:[#allocation34_spill] sm:$0xff]  ;;  %v3865_v9 = vld [vmem:[#allocation35_spill] sm:$0xff]  ;;  %v965_v13 = vadd.f32 %v3380_v39, %v3376_v16 }
 0x174   :  { %1974 = vpow2.f32 %v915_v49  ;;  %1011 = vadd.xlane.f32.xlu0 %v1010_v11 }
 0x175   :  { %v688_v29 = vpop.xlane.xlu0 %687  ;;  %1976 = vpow2.f32 %v853_v28  ;;  %966 = vadd.xlane.f32.xlu1 %v965_v13 }
 0x176   :  { %v733_v63 = vpop.xlane.xlu1 %732  ;;  %v771_v17 = vsub.f32 %v3065_v6, %v688_v29  ;;  %v772_v14 = vsub.f32 %v3864_v52, %v688_v29  ;;  %1978 = vpow2.f32 %v855_v12  ;;  %v3388_v45 = vpop.eup %1964 }
 0x177   :  { %v801_v8 = vsub.f32 %v3865_v9, %v733_v63  ;;  %v802_v49 = vsub.f32 %v3866_v32, %v733_v63  ;;  %v3390_v6 = vpop.eup %1966  ;;  %v3867_v63 = vld [vmem:[#allocation37_spill] sm:$0xff] }
 0x178   :  { %v857_v59 = vmul.f32 1.442695, %v771_v17  ;;  %v859_v28 = vmul.f32 1.442695, %v772_v14  ;;  %v3392_v12 = vpop.eup %1968 }
 0x179   :  { %v917_v36 = vmul.f32 1.442695, %v801_v8  ;;  %v919_v62 = vmul.f32 1.442695, %v802_v49  ;;  %v3396_v9 = vpop.eup %1970  ;;  %v1013_v14 = vadd.f32 %v3392_v12, %v3390_v6 }
 0x17a   :  { %1980 = vpow2.f32 %v857_v59 }
 0x17b   :  { %1982 = vpow2.f32 %v917_v36  ;;  %1014 = vadd.xlane.f32.xlu1 %v1013_v14 }
 0x17c   :  { %v736_v0 = vpop.xlane.xlu0 %735  ;;  %1984 = vpow2.f32 %v919_v62 }
 0x17d   :  { %v803_v29 = vsub.f32 %v3111_v19, %v736_v0  ;;  %v804_v52 = vsub.f32 %v3867_v63, %v736_v0  ;;  %v691_v17 = vpop.xlane.xlu1 %690  ;;  %1986 = vpow2.f32 %v859_v28  ;;  %v3402_v32 = vpop.eup %1972  ;;  %v968_v19 = vadd.f32 %v3396_v9, %v3388_v45 }
 0x17e   :  { %v773_v11 = vsub.f32 %v3128_v35, %v691_v17  ;;  %v774_v59 = vsub.f32 %v3136_v33, %v691_v17  ;;  %3868 = vst [vmem:[#allocation14_spill] sm:$0xff] %v3402_v32  ;;  %v3406_v49 = vpop.eup %1974 }
 0x17f   :  { %v921_v8 = vmul.f32 1.442695, %v803_v29  ;;  %v923_v36 = vmul.f32 1.442695, %v804_v52  ;;  %v3408_v0 = vpop.eup %1976  ;;  %969 = vadd.xlane.f32.xlu0 %v968_v19  ;;  %v1016_v35 = vadd.f32 %v3406_v49, %v3402_v32 }
 0x180   :  { %v861_v62 = vmul.f32 1.442695, %v773_v11  ;;  %v863_v13 = vmul.f32 1.442695, %v774_v59  ;;  %v3412_v33 = vpop.eup %1978 }
 0x181   :  { %1988 = vpow2.f32 %v921_v8  ;;  %v971_v11 = vadd.f32 %v3412_v33, %v3408_v0 }
 0x182   :  { %1990 = vpow2.f32 %v923_v36 }
 0x183   :  { %v694_v28 = vpop.xlane.xlu0 %693  ;;  %1992 = vpow2.f32 %v861_v62  ;;  %972 = vadd.xlane.f32.xlu1 %v971_v11  ;;  %1017 = vadd.xlane.f32.xlu0 %v1016_v35 }
 0x184   :  { %v739_v29 = vpop.xlane.xlu1 %738  ;;  %v775_v63 = vsub.f32 %v3155_v20, %v694_v28  ;;  %v776_v52 = vsub.f32 %v3159_v7, %v694_v28  ;;  %1994 = vpow2.f32 %v863_v13  ;;  %v3420_v8 = vpop.eup %1980 }
 0x185   :  { %v805_v17 = vsub.f32 %v3166_v50, %v739_v29  ;;  %v806_v14 = vsub.f32 %v3170_v15, %v739_v29  ;;  %v3422_v20 = vpop.eup %1982 }
 0x186   :  { %v865_v59 = vmul.f32 1.442695, %v775_v63  ;;  %v867_v32 = vmul.f32 1.442695, %v776_v52  ;;  %v3426_v13 = vpop.eup %1984 }
 0x187   :  { %v925_v36 = vmul.f32 1.442695, %v805_v17  ;;  %v927_v19 = vmul.f32 1.442695, %v806_v14  ;;  %v742_v62 = vpop.xlane.xlu0 %741  ;;  %v3430_v63 = vpop.eup %1986  ;;  %v1019_v17 = vadd.f32 %v3426_v13, %v3422_v20 }
 0x188   :  { %1996 = vpow2.f32 %v865_v59  ;;  %v697_v7 = vpop.xlane.xlu1 %696  ;;  %v807_v50 = vsub.f32 %v3185_v26, %v742_v62  ;;  %v808_v15 = vsub.f32 %v3189_v43, %v742_v62  ;;  %v974_v43 = vadd.f32 %v3430_v63, %v3420_v8 }
 0x189   :  { %1998 = vpow2.f32 %v925_v36  ;;  %v777_v28 = vsub.f32 %v3196_v31, %v697_v7  ;;  %v778_v29 = vsub.f32 %v3200_v42, %v697_v7  ;;  %1020 = vadd.xlane.f32.xlu1 %v1019_v17 }
 0x18a   :  { %2000 = vpow2.f32 %v927_v19  ;;  %v929_v52 = vmul.f32 1.442695, %v807_v50  ;;  %v931_v35 = vmul.f32 1.442695, %v808_v15  ;;  %975 = vadd.xlane.f32.xlu0 %v974_v43 }
 0x18b   :  { %2002 = vpow2.f32 %v867_v32  ;;  %v869_v14 = vmul.f32 1.442695, %v777_v28  ;;  %v871_v26 = vmul.f32 1.442695, %v778_v29  ;;  %v700_v11 = vpop.xlane.xlu0 %699  ;;  %v3436_v59 = vpop.eup %1988 }
 0x18c   :  { %2004 = vpow2.f32 %v929_v52  ;;  %v745_v31 = vpop.xlane.xlu1 %744  ;;  %v779_v42 = vsub.f32 %v3220_v40, %v700_v11  ;;  %v780_v36 = vsub.f32 %v3224_v54, %v700_v11  ;;  %v3440_v19 = vpop.eup %1990 }
 0x18d   :  { %2006 = vpow2.f32 %v869_v14  ;;  %v809_v32 = vsub.f32 %v3214_v18, %v745_v31  ;;  %v810_v62 = vsub.f32 %v3228_v24, %v745_v31  ;;  %v3444_v7 = vpop.eup %1992  ;;  %v1022_v15 = vadd.f32 %v3440_v19, %v3436_v59 }
 0x18e   :  { %2008 = vpow2.f32 %v871_v26  ;;  %v873_v50 = vmul.f32 1.442695, %v779_v42  ;;  %v3448_v28 = vpop.eup %1994  ;;  %v875_v29 = vmul.f32 1.442695, %v780_v36 }
 0x18f   :  { %2010 = vpow2.f32 %v931_v35  ;;  %v933_v40 = vmul.f32 1.442695, %v809_v32  ;;  %v935_v54 = vmul.f32 1.442695, %v810_v62  ;;  %v748_v52 = vpop.xlane.xlu0 %747  ;;  %v977_v17 = vadd.f32 %v3448_v28, %v3444_v7  ;;  %1023 = vadd.xlane.f32.xlu0 %v1022_v15 }
 0x190   :  { %2012 = vpow2.f32 %v873_v50  ;;  %v811_v18 = vsub.f32 %v3234_v4, %v748_v52  ;;  %v812_v24 = vsub.f32 %v3236_v21, %v748_v52 }
 0x191   :  { %2014 = vpow2.f32 %v933_v40  ;;  %978 = vadd.xlane.f32.xlu1 %v977_v17 }
 0x192   :  { %v3454_v14 = vpop.eup %1996  ;;  %2016 = vpow2.f32 %v935_v54  ;;  %v937_v26 = vmul.f32 1.442695, %v811_v18  ;;  %v939_v11 = vmul.f32 1.442695, %v812_v24 }
 0x193   :  { %v3456_v35 = vpop.eup %1998  ;;  %2018 = vpow2.f32 %v875_v29 }
 0x194   :  { %v3458_v43 = vpop.eup %2000  ;;  %2020 = vpow2.f32 %v937_v26 }
 0x195   :  { %v3460_v4 = vpop.eup %2002  ;;  %2022 = vpow2.f32 %v939_v11  ;;  %v1025_v21 = vadd.f32 %v3458_v43, %v3456_v35 }
 0x196   :  { %v3464_v31 = vpop.eup %2004  ;;  %v980_v42 = vadd.f32 %v3460_v4, %v3454_v14 }
 0x197   :  { %3869 = vst [vmem:[#allocation15_spill] sm:$0xff] %v3464_v31  ;;  %v3468_v36 = vpop.eup %2006  ;;  %1026 = vadd.xlane.f32.xlu1 %v1025_v21 }
 0x198   :  { %3870 = vst [vmem:[#allocation16_spill] sm:$0xff] %v3468_v36  ;;  %v3470_v32 = vpop.eup %2008  ;;  %981 = vadd.xlane.f32.xlu0 %v980_v42 }
 0x199   :  { %3871 = vst [vmem:[#allocation17_spill] sm:$0xff] %v3470_v32  ;;  %v3472_v62 = vpop.eup %2010  ;;  %v983_v50 = vadd.f32 %v3470_v32, %v3468_v36 }
 0x19a   :  { %v3476_v15 = vpop.eup %2012  ;;  %v1028_v40 = vadd.f32 %v3472_v62, %v3464_v31 }
 0x19b   :  { %3872 = vst [vmem:[#allocation18_spill] sm:$0xff] %v3476_v15  ;;  %v3480_v54 = vpop.eup %2014  ;;  %984 = vadd.xlane.f32.xlu1 %v983_v50 }
 0x19c   :  { %3873 = vst [vmem:[#allocation19_spill] sm:$0xff] %v3480_v54  ;;  %v3482_v29 = vpop.eup %2016  ;;  %1029 = vadd.xlane.f32.xlu0 %v1028_v40 }
 0x19d   :  { %3874 = vst [vmem:[#allocation20_spill] sm:$0xff] %v3482_v29  ;;  %v3484_v52 = vpop.eup %2018  ;;  %v1031_v18 = vadd.f32 %v3482_v29, %v3480_v54 }
 0x19e   :  { %3875 = vst [vmem:[#allocation21_spill] sm:$0xff] %v3484_v52  ;;  %v3488_v24 = vpop.eup %2020  ;;  %v986_v17 = vadd.f32 %v3484_v52, %v3476_v15 }
 0x19f   :  { %3876 = vst [vmem:[#allocation22_spill] sm:$0xff] %v3488_v24  ;;  %v3492_v26 = vpop.eup %2022  ;;  %1032 = vadd.xlane.f32.xlu1 %v1031_v18 }
 0x1a0   :  { %3877 = vst [vmem:[#allocation23_spill] sm:$0xff] %v3492_v26  ;;  %987 = vadd.xlane.f32.xlu0 %v986_v17  ;;  %v1034_v11 = vadd.f32 %v3492_v26, %v3488_v24 }
 0x1a4   :  { %1035 = vadd.xlane.f32.xlu0 %v1034_v11 }
 0x1cc   :  { %v943_v21 = vpop.xlane.xlu1 %942 }
 0x1cd   :  { %2024 = vrcp.f32 %v943_v21 }
 0x1d1   :  { %v991_v42 = vpop.xlane.xlu1 %990 }
 0x1d2   :  { %v946_v50 = vpop.xlane.xlu0 %945 }
 0x1d3   :  { %2026 = vrcp.f32 %v946_v50 }
 0x1d4   :  { %2028 = vrcp.f32 %v991_v42 }
 0x1d6   :  { %v994_v40 = vpop.xlane.xlu0 %993 }
 0x1d7   :  { %2030 = vrcp.f32 %v994_v40  ;;  %v2025_v29 = vpop.eup %2024 }
 0x1d8   :  { %v1070_v18 = vmul.f32 %v2025_v29, %v3252_v55  ;;  %v1069_v11 = vmul.f32 %v2025_v29, %v3250_v30 }
 0x1d9   :  { %v949_v54 = vpop.xlane.xlu1 %948 }
 0x1da   :  { %2032 = vrcp.f32 %v949_v54 }
 0x1dd   :  { %v2027_v36 = vpop.eup %2026 }
 0x1de   :  { %v2029_v52 = vpop.eup %2028  ;;  %v1072_v17 = vmul.f32 %v2027_v36, %v3268_v60  ;;  %v1071_v21 = vmul.f32 %v2027_v36, %v3264_v56 }
 0x1df   :  { %v1102_v40 = vmul.f32 %v2029_v52, %v3262_v1  ;;  %v1101_v32 = vmul.f32 %v2029_v52, %v3260_v37 }
 0x1e0   :  { %v997_v15 = vpop.xlane.xlu1 %996  ;;  %v1134_v50 = vpack.c.bf16 %v1072_v17, %v1070_v18  ;;  %v1133_v42 = vpack.c.bf16 %v1071_v21, %v1069_v11 }
 0x1e1   :  { %v952_v24 = vpop.xlane.xlu0 %951  ;;  %v2031_v26 = vpop.eup %2030 }
 0x1e2   :  { %2034 = vrcp.f32 %v952_v24  ;;  %1325 = vmatprep.mubr.bf16.mxu0 %v1134_v50  ;;  %v1104_v54 = vmul.f32 %v2031_v26, %v3278_v46  ;;  %v1103_v55 = vmul.f32 %v2031_v26, %v3276_v2 }
 0x1e3   :  { %2036 = vrcp.f32 %v997_v15  ;;  %1326 = vmatmul.mubr.bf16.vlgmr.msra.gmra.mrb[0].mxu0 %v1133_v42 }
 0x1e4   :  { %v1150_v30 = vpack.c.bf16 %v1104_v54, %v1102_v40  ;;  %v1149_v56 = vpack.c.bf16 %v1103_v55, %v1101_v32  ;;  %v2033_v36 = vpop.eup %2032 }
 0x1e5   :  { %v1000_v31 = vpop.xlane.xlu0 %999  ;;  %v1074_v24 = vmul.f32 %v2033_v36, %v3284_v48  ;;  %v1073_v2 = vmul.f32 %v2033_v36, %v3280_v25 }
 0x1e6   :  { %2038 = vrcp.f32 %v1000_v31  ;;  %1389 = vmatprep.mubr.bf16.mxu1 %v1150_v30 }
 0x1e7   :  { %v955_v60 = vpop.xlane.xlu1 %954  ;;  %1390 = vmatmul.mubr.bf16.vlgmr.msra.gmra.mrb[0].mxu1 %v1149_v56 }
 0x1e8   :  { %2040 = vrcp.f32 %v955_v60 }
 0x1ec   :  { %v2035_v1 = vpop.eup %2034 }
 0x1ed   :  { %v1076_v37 = vmul.f32 %v2035_v1, %v3300_v53  ;;  %v1075_v46 = vmul.f32 %v2035_v1, %v3292_v34  ;;  %v2037_v52 = vpop.eup %2036 }
 0x1ee   :  { %v1003_v29 = vpop.xlane.xlu1 %1002  ;;  %v1106_v11 = vmul.f32 %v2037_v52, %v3296_v10  ;;  %v1105_v53 = vmul.f32 %v2037_v52, %v3294_v3  ;;  %v3878_v52 = vld [vmem:[#allocation9_spill] sm:$0xff] }
 0x1ef   :  { %v958_v15 = vpop.xlane.xlu0 %957  ;;  %v1136_v32 = vpack.c.bf16 %v1076_v37, %v1074_v24  ;;  %v1135_v31 = vpack.c.bf16 %v1075_v46, %v1073_v2 }
 0x1f0   :  { %2042 = vrcp.f32 %v958_v15  ;;  %v2039_v17 = vpop.eup %2038 }
 0x1f1   :  { %2044 = vrcp.f32 %v1003_v29  ;;  %1333 = vmatprep.mubr.bf16.mxu0 %v1136_v32  ;;  %v1108_v48 = vmul.f32 %v2039_v17, %v3310_v57  ;;  %v1107_v25 = vmul.f32 %v2039_v17, %v3306_v38 }
 0x1f2   :  { %1334 = vmatmul.mubr.bf16.gmra.mrb[4].mxu0 %v1135_v31  ;;  %v2041_v21 = vpop.eup %2040  ;;  %v3879_v31 = vld [vmem:[#allocation8_spill] sm:$0xff] }
 0x1f3   :  { %v1006_v18 = vpop.xlane.xlu0 %1005  ;;  %v1152_v34 = vpack.c.bf16 %v1108_v48, %v1106_v11  ;;  %v1151_v50 = vpack.c.bf16 %v1107_v25, %v1105_v53  ;;  %v1078_v55 = vmul.f32 %v2041_v21, %v3316_v47  ;;  %v1077_v57 = vmul.f32 %v2041_v21, %v3312_v44  ;;  %v3880_v53 = vld [vmem:[#allocation11_spill] sm:$0xff]  ;;  %v3881_v21 = vld [vmem:[#allocation13_spill] sm:$0xff] }
 0x1f4   :  { %2046 = vrcp.f32 %v1006_v18 }
 0x1f5   :  { %v961_v26 = vpop.xlane.xlu1 %960  ;;  %1397 = vmatprep.mubr.bf16.mxu1 %v1152_v34 }
 0x1f6   :  { %2048 = vrcp.f32 %v961_v26  ;;  %1398 = vmatmul.mubr.bf16.gmra.mrb[4].mxu1 %v1151_v50  ;;  %v3882_v50 = vld [vmem:[#allocation10_spill] sm:$0xff] }
 0x1fa   :  { %v2043_v40 = vpop.eup %2042 }
 0x1fb   :  { %v1009_v42 = vpop.xlane.xlu1 %1008  ;;  %v1080_v10 = vmul.f32 %v2043_v40, %v3332_v58  ;;  %v1079_v3 = vmul.f32 %v2043_v40, %v3324_v41  ;;  %v2045_v60 = vpop.eup %2044 }
 0x1fc   :  { %v964_v54 = vpop.xlane.xlu0 %963  ;;  %v1110_v1 = vmul.f32 %v2045_v60, %v3328_v27  ;;  %v1109_v58 = vmul.f32 %v2045_v60, %v3326_v51 }
 0x1fd   :  { %2050 = vrcp.f32 %v964_v54  ;;  %v1138_v38 = vpack.c.bf16 %v1080_v10, %v1078_v55  ;;  %v1137_v30 = vpack.c.bf16 %v1079_v3, %v1077_v57 }
 0x1fe   :  { %2052 = vrcp.f32 %v1009_v42  ;;  %v2047_v29 = vpop.eup %2046  ;;  %v3883_v42 = vld [vmem:[#allocation12_spill] sm:$0xff] }
 0x1ff   :  { %1341 = vmatprep.mubr.bf16.mxu0 %v1138_v38  ;;  %v1112_v47 = vmul.f32 %v2047_v29, %v3342_v22  ;;  %v1111_v44 = vmul.f32 %v2047_v29, %v3338_v5 }
 0x200   :  { %1342 = vmatmul.mubr.bf16.gmra.mrb[8].mxu0 %v1137_v30  ;;  %v2049_v15 = vpop.eup %2048 }
 0x201   :  { %v1012_v36 = vpop.xlane.xlu0 %1011  ;;  %v1154_v41 = vpack.c.bf16 %v1112_v47, %v1110_v1  ;;  %v1153_v24 = vpack.c.bf16 %v1111_v44, %v1109_v58  ;;  %v1082_v32 = vmul.f32 %v2049_v15, %v3878_v52  ;;  %v1081_v22 = vmul.f32 %v2049_v15, %v3879_v31 }
 0x202   :  { %v967_v56 = vpop.xlane.xlu1 %966  ;;  %2054 = vrcp.f32 %v1012_v36 }
 0x203   :  { %2056 = vrcp.f32 %v967_v56  ;;  %1405 = vmatprep.mubr.bf16.mxu1 %v1154_v41 }
 0x204   :  { %1406 = vmatmul.mubr.bf16.gmra.mrb[8].mxu1 %v1153_v24 }
 0x207   :  { %v2051_v2 = vpop.eup %2050 }
 0x208   :  { %v1015_v37 = vpop.xlane.xlu1 %1014  ;;  %v1084_v27 = vmul.f32 %v2051_v2, %v3364_v61  ;;  %v1083_v51 = vmul.f32 %v2051_v2, %v3356_v23  ;;  %v2053_v26 = vpop.eup %2052 }
 0x209   :  { %v1114_v25 = vmul.f32 %v2053_v26, %v3880_v53  ;;  %v1113_v61 = vmul.f32 %v2053_v26, %v3882_v50 }
 0x20a   :  { %v1140_v5 = vpack.c.bf16 %v1084_v27, %v1082_v32  ;;  %v1139_v18 = vpack.c.bf16 %v1083_v51, %v1081_v22 }
 0x20c   :  { %v970_v46 = vpop.xlane.xlu0 %969  ;;  %v2055_v48 = vpop.eup %2054  ;;  %1349 = vmatprep.mubr.bf16.mxu0 %v1140_v5 }
 0x20d   :  { %2058 = vrcp.f32 %v970_v46  ;;  %1350 = vmatmul.mubr.bf16.gmra.mrb[12].mxu0 %v1139_v18  ;;  %v1116_v34 = vmul.f32 %v2055_v48, %v3881_v21  ;;  %v1115_v40 = vmul.f32 %v2055_v48, %v3883_v42  ;;  %v2057_v54 = vpop.eup %2056 }
 0x20e   :  { %2060 = vrcp.f32 %v1015_v37  ;;  %v1086_v60 = vmul.f32 %v2057_v54, %v3380_v39  ;;  %v1085_v30 = vmul.f32 %v2057_v54, %v3376_v16 }
 0x20f   :  { %v1156_v23 = vpack.c.bf16 %v1116_v34, %v1114_v25  ;;  %v1155_v55 = vpack.c.bf16 %v1115_v40, %v1113_v61 }
 0x210   :  { %v973_v17 = vpop.xlane.xlu1 %972  ;;  %v1018_v11 = vpop.xlane.xlu0 %1017 }
 0x211   :  { %2062 = vrcp.f32 %v1018_v11  ;;  %1413 = vmatprep.mubr.bf16.mxu1 %v1156_v23 }
 0x212   :  { %2064 = vrcp.f32 %v973_v17  ;;  %1414 = vmatmul.mubr.bf16.gmra.mrb[12].mxu1 %v1155_v55  ;;  %v3885_v55 = vld [vmem:[#allocation15_spill] sm:$0xff] }
 0x216   :  { %v1021_v10 = vpop.xlane.xlu1 %1020 }
 0x217   :  { %v976_v57 = vpop.xlane.xlu0 %975  ;;  %v2059_v3 = vpop.eup %2058 }
 0x218   :  { %2066 = vrcp.f32 %v976_v57  ;;  %v1088_v38 = vmul.f32 %v2059_v3, %v3396_v9  ;;  %v1087_v56 = vmul.f32 %v2059_v3, %v3388_v45  ;;  %v2061_v36 = vpop.eup %2060  ;;  %v3884_v9 = vld [vmem:[#allocation14_spill] sm:$0xff] }
 0x219   :  { %2068 = vrcp.f32 %v1021_v10  ;;  %v1118_v15 = vmul.f32 %v2061_v36, %v3392_v12  ;;  %v1117_v41 = vmul.f32 %v2061_v36, %v3390_v6  ;;  %v3889_v36 = vld [vmem:[#allocation18_spill] sm:$0xff] }
 0x21a   :  { %v1142_v1 = vpack.c.bf16 %v1088_v38, %v1086_v60  ;;  %v1141_v47 = vpack.c.bf16 %v1087_v56, %v1085_v30  ;;  %v3887_v60 = vld [vmem:[#allocation21_spill] sm:$0xff]  ;;  %v3888_v30 = vld [vmem:[#allocation16_spill] sm:$0xff] }
 0x21b   :  { %v2063_v44 = vpop.eup %2062 }
 0x21c   :  { %v1024_v29 = vpop.xlane.xlu0 %1023  ;;  %1357 = vmatprep.mubr.bf16.mxu0 %v1142_v1  ;;  %v1120_v39 = vmul.f32 %v2063_v44, %v3406_v49  ;;  %v1119_v24 = vmul.f32 %v2063_v44, %v3884_v9  ;;  %v2065_v16 = vpop.eup %2064  ;;  %v3891_v44 = vld [vmem:[#allocation23_spill] sm:$0xff]  ;;  %v3893_v9 = vld [vmem:[#allocation22_spill] sm:$0xff] }
 0x21d   :  { %2070 = vrcp.f32 %v1024_v29  ;;  %1358 = vmatmul.mubr.bf16.gmra.mrb[16].mxu0 %v1141_v47  ;;  %v1090_v32 = vmul.f32 %v2065_v16, %v3412_v33  ;;  %v1089_v49 = vmul.f32 %v2065_v16, %v3408_v0  ;;  %v3890_v47 = vld [vmem:[#allocation20_spill] sm:$0xff] }
 0x21e   :  { %v979_v58 = vpop.xlane.xlu1 %978  ;;  %v1158_v37 = vpack.c.bf16 %v1120_v39, %v1118_v15  ;;  %v1157_v45 = vpack.c.bf16 %v1119_v24, %v1117_v41  ;;  %v3892_v39 = vld [vmem:[#allocation19_spill] sm:$0xff] }
 0x21f   :  { %2072 = vrcp.f32 %v979_v58 }
 0x220   :  { %1421 = vmatprep.mubr.bf16.mxu1 %v1158_v37 }
 0x221   :  { %1422 = vmatmul.mubr.bf16.gmra.mrb[16].mxu1 %v1157_v45 }
 0x222   :  { %v2067_v46 = vpop.eup %2066 }
 0x223   :  { %v2069_v27 = vpop.eup %2068  ;;  %v1092_v12 = vmul.f32 %v2067_v46, %v3430_v63  ;;  %v1091_v6 = vmul.f32 %v2067_v46, %v3420_v8 }
 0x224   :  { %v1027_v2 = vpop.xlane.xlu1 %1026  ;;  %v1122_v18 = vmul.f32 %v2069_v27, %v3426_v13  ;;  %v1121_v17 = vmul.f32 %v2069_v27, %v3422_v20 }
 0x225   :  { %v982_v52 = vpop.xlane.xlu0 %981  ;;  %v1144_v22 = vpack.c.bf16 %v1092_v12, %v1090_v32  ;;  %v1143_v51 = vpack.c.bf16 %v1091_v6, %v1089_v49 }
 0x226   :  { %2074 = vrcp.f32 %v982_v52 }
 0x227   :  { %2076 = vrcp.f32 %v1027_v2  ;;  %v2071_v26 = vpop.eup %2070  ;;  %1365 = vmatprep.mubr.bf16.mxu0 %v1144_v22 }
 0x228   :  { %v985_v31 = vpop.xlane.xlu1 %984  ;;  %v1124_v33 = vmul.f32 %v2071_v26, %v3440_v19  ;;  %v1123_v63 = vmul.f32 %v2071_v26, %v3436_v59  ;;  %1366 = vmatmul.mubr.bf16.gmra.mrb[20].mxu0 %v1143_v51 }
 0x229   :  { %v1030_v5 = vpop.xlane.xlu0 %1029  ;;  %v2073_v53 = vpop.eup %2072 }
 0x22a   :  { %2078 = vrcp.f32 %v1030_v5  ;;  %v1160_v0 = vpack.c.bf16 %v1124_v33, %v1122_v18  ;;  %v1159_v8 = vpack.c.bf16 %v1123_v63, %v1121_v17  ;;  %v1094_v21 = vmul.f32 %v2073_v53, %v3448_v28 }
 0x22b   :  { %2080 = vrcp.f32 %v985_v31  ;;  %v1093_v20 = vmul.f32 %v2073_v53, %v3444_v7 }
 0x22c   :  { %v1033_v11 = vpop.xlane.xlu1 %1032  ;;  %1429 = vmatprep.mubr.bf16.mxu1 %v1160_v0 }
 0x22d   :  { %v988_v48 = vpop.xlane.xlu0 %987  ;;  %1430 = vmatmul.mubr.bf16.gmra.mrb[20].mxu1 %v1159_v8 }
 0x22e   :  { %2082 = vrcp.f32 %v988_v48 }
 0x22f   :  { %2084 = vrcp.f32 %v1033_v11 }
 0x230   :  { %v2075_v25 = vpop.eup %2074 }
 0x231   :  { %v1036_v13 = vpop.xlane.xlu0 %1035  ;;  %v1096_v19 = vmul.f32 %v2075_v25, %v3460_v4  ;;  %v1095_v59 = vmul.f32 %v2075_v25, %v3454_v14  ;;  %v2077_v34 = vpop.eup %2076  ;;  %v3886_v14 = vld [vmem:[#allocation17_spill] sm:$0xff] }
 0x232   :  { %2086 = vrcp.f32 %v1036_v13  ;;  %v1126_v40 = vmul.f32 %v2077_v34, %v3458_v43  ;;  %v1125_v23 = vmul.f32 %v2077_v34, %v3456_v35 }
 0x233   :  { %v1146_v50 = vpack.c.bf16 %v1096_v19, %v1094_v21  ;;  %v1145_v61 = vpack.c.bf16 %v1095_v59, %v1093_v20 }
 0x234   :  { %v2079_v42 = vpop.eup %2078 }
 0x235   :  { %1373 = vmatprep.mubr.bf16.mxu0 %v1146_v50  ;;  %v1128_v54 = vmul.f32 %v2079_v42, %v3472_v62  ;;  %v1127_v28 = vmul.f32 %v2079_v42, %v3885_v55  ;;  %v2081_v10 = vpop.eup %2080 }
 0x236   :  { %1374 = vmatmul.mubr.bf16.gmra.mrb[24].mxu0 %v1145_v61  ;;  %v1098_v3 = vmul.f32 %v2081_v10, %v3886_v14  ;;  %v1097_v56 = vmul.f32 %v2081_v10, %v3888_v30 }
 0x237   :  { %v1162_v4 = vpack.c.bf16 %v1128_v54, %v1126_v40  ;;  %v1161_v7 = vpack.c.bf16 %v1127_v28, %v1125_v23 }
 0x238   :  { %v2083_v57 = vpop.eup %2082 }
 0x239   :  { %1437 = vmatprep.mubr.bf16.mxu1 %v1162_v4  ;;  %v1100_v38 = vmul.f32 %v2083_v57, %v3887_v60  ;;  %v1099_v43 = vmul.f32 %v2083_v57, %v3889_v36  ;;  %v2085_v29 = vpop.eup %2084 }
 0x23a   :  { %1438 = vmatmul.mubr.bf16.gmra.mrb[24].mxu1 %v1161_v7  ;;  %v1130_v58 = vmul.f32 %v2085_v29, %v3890_v47  ;;  %v1129_v41 = vmul.f32 %v2085_v29, %v3892_v39 }
 0x23b   :  { %v1148_v62 = vpack.c.bf16 %v1100_v38, %v1098_v3  ;;  %v1147_v35 = vpack.c.bf16 %v1099_v43, %v1097_v56 }
 0x23c   :  { %v2087_v1 = vpop.eup %2086 }
 0x23d   :  { %1381 = vmatprep.mubr.bf16.mxu0 %v1148_v62  ;;  %v1132_v15 = vmul.f32 %v2087_v1, %v3891_v44  ;;  %v1131_v24 = vmul.f32 %v2087_v1, %v3893_v9 }
 0x23e   :  { %1382 = vmatmul.mubr.bf16.gmra.mrb[28].mxu0 %v1147_v35 }
 0x23f   :  { %v1164_v16 = vpack.c.bf16 %v1132_v15, %v1130_v58  ;;  %v1163_v37 = vpack.c.bf16 %v1131_v24, %v1129_v41 }
 0x241   :  { %1445 = vmatprep.mubr.bf16.mxu1 %v1164_v16 }
 0x242   :  { %1446 = vmatmul.mubr.bf16.gmra.mrb[28].mxu1 %v1163_v37 }
 0x2b6   :  { %v1759_v45 = vpop.f32.mrb[0].mxu0 }
 0x2b7   :  { %v1760_v2 = vpop.f32.mrb[1].mxu0 }
 0x2b8   :  { %v1761_v46 = vadd.f32 %v1760_v2, %v1759_v45  ;;  %v1762_v52 = vpop.f32.mrb[2].mxu0 }
 0x2b9   :  { %v1763_v32 = vpop.f32.mrb[3].mxu0 }
 0x2ba   :  { %v1486_v27 = vmin.f32 %v1761_v46, 0.0  ;;  %v1764_v12 = vadd.f32 %v1763_v32, %v1762_v52  ;;  %v1807_v49 = vpop.f32.mrb[0].mxu1  ;;  %vm1454_vm0 = vcmp.gt.f32.partialorder %v1761_v46, 0.0 }
 0x2bb   :  { %v1808_v6 = vpop.f32.mrb[1].mxu1 }
 0x2bc   :  { %v1518_v31 = vmul.f32 1.442695, %v1486_v27  ;;  %v1487_v22 = vmin.f32 %v1764_v12, 0.0  ;;  %v1809_v51 = vadd.f32 %v1808_v6, %v1807_v49  ;;  %v1810_v26 = vpop.f32.mrb[2].mxu1  ;;  %vm1455_vm1 = vcmp.gt.f32.partialorder %v1764_v12, 0.0 }
 0x2bd   :  { %v1811_v5 = vpop.f32.mrb[3].mxu1 }
 0x2be   :  { %2088 = vpow2.f32 %v1518_v31  ;;  %v1520_v18 = vmul.f32 1.442695, %v1487_v22  ;;  %v1502_v33 = vmin.f32 %v1809_v51, 0.0  ;;  %v1812_v17 = vadd.f32 %v1811_v5, %v1810_v26 }
 0x2bf   :  { %vm1470_vm2 = vcmp.gt.f32.partialorder %v1809_v51, 0.0 }
 0x2c0   :  { %2090 = vpow2.f32 %v1520_v18  ;;  %v1550_v63 = vmul.f32 1.442695, %v1502_v33  ;;  %v1503_v0 = vmin.f32 %v1812_v17, 0.0  ;;  %vm1471_vm3 = vcmp.gt.f32.partialorder %v1812_v17, 0.0 }
 0x2c2   :  { %2092 = vpow2.f32 %v1550_v63  ;;  %v1552_v8 = vmul.f32 1.442695, %v1503_v0 }
 0x2c4   :  { %2094 = vpow2.f32 %v1552_v8 }
 0x2c5   :  { %v1765_v11 = vpop.f32.mrb[4].mxu0 }
 0x2c6   :  { %v1766_v48 = vpop.f32.mrb[5].mxu0 }
 0x2c7   :  { %v3560_v53 = vadd.f32 %v1766_v48, %v1765_v11  ;;  %v1768_v25 = vpop.f32.mrb[6].mxu0 }
 0x2c8   :  { %v1769_v13 = vpop.f32.mrb[7].mxu0  ;;  %v2089_v20 = vpop.eup %2088 }
 0x2c9   :  { %v1488_v21 = vmin.f32 %v3560_v53, 0.0  ;;  %v3563_v19 = vadd.f32 %v1769_v13, %v1768_v25  ;;  %v1813_v59 = vpop.f32.mrb[4].mxu1  ;;  %v1711_v34 = vadd.f32 -1.0, %v2089_v20  ;;  %vm1456_vm4 = vcmp.gt.f32.partialorder %v3560_v53, 0.0 }
 0x2ca   :  { %v1814_v42 = vpop.f32.mrb[5].mxu1  ;;  %v2091_v40 = vpop.eup %2090 }
 0x2cb   :  { %v1522_v50 = vmul.f32 1.442695, %v1488_v21  ;;  %v1489_v61 = vmin.f32 %v3563_v19, 0.0  ;;  %v3566_v54 = vadd.f32 %v1814_v42, %v1813_v59  ;;  %v1816_v23 = vpop.f32.mrb[6].mxu1  ;;  %v1614_v55 = vsel %vm1454_vm0, %v1761_v46, %v1711_v34 }
 0x2cc   :  { %v1712_v28 = vadd.f32 -1.0, %v2091_v40  ;;  %v1817_v4 = vpop.f32.mrb[7].mxu1  ;;  %v2093_v7 = vpop.eup %2092  ;;  %1646 = vst [vmem:[#allocation5] sm:$0xff] %v1614_v55  ;;  %vm1457_vm5 = vcmp.gt.f32.partialorder %v3563_v19, 0.0 }
 0x2cd   :  { %2096 = vpow2.f32 %v1522_v50  ;;  %v1524_v10 = vmul.f32 1.442695, %v1489_v61  ;;  %v1504_v57 = vmin.f32 %v3566_v54, 0.0  ;;  %v3569_v14 = vadd.f32 %v1817_v4, %v1816_v23 }
 0x2ce   :  { %v1615_v3 = vsel %vm1455_vm1, %v1764_v12, %v1712_v28  ;;  %v1727_v60 = vadd.f32 -1.0, %v2093_v7  ;;  %v2095_v36 = vpop.eup %2094  ;;  %vm1472_vm6 = vcmp.gt.f32.partialorder %v3566_v54, 0.0 }
 0x2cf   :  { %2098 = vpow2.f32 %v1524_v10  ;;  %1647 = vst [vmem:[#allocation5 + $0x8] sm:$0xff] %v1615_v3  ;;  %v1554_v38 = vmul.f32 1.442695, %v1504_v57  ;;  %v1505_v30 = vmin.f32 %v3569_v14, 0.0  ;;  %v1728_v62 = vadd.f32 -1.0, %v2095_v36 }
 0x2d0   :  { %v1630_v43 = vsel %vm1470_vm2, %v1809_v51, %v1727_v60  ;;  %vm1473_vm7 = vcmp.gt.f32.partialorder %v3569_v14, 0.0 }
 0x2d1   :  { %1662 = vst [vmem:[#allocation5 + $0x80] sm:$0xff] %v1630_v43  ;;  %2100 = vpow2.f32 %v1554_v38  ;;  %v1556_v35 = vmul.f32 1.442695, %v1505_v30  ;;  %v1631_v44 = vsel %vm1471_vm3, %v1812_v17, %v1728_v62 }
 0x2d2   :  { %1663 = vst [vmem:[#allocation5 + $0x88] sm:$0xff] %v1631_v44 }
 0x2d3   :  { %v1771_v56 = vpop.f32.mrb[8].mxu0  ;;  %2102 = vpow2.f32 %v1556_v35 }
 0x2d4   :  { %v1772_v29 = vpop.f32.mrb[9].mxu0 }
 0x2d5   :  { %v3572_v1 = vadd.f32 %v1772_v29, %v1771_v56  ;;  %v1774_v47 = vpop.f32.mrb[10].mxu0 }
 0x2d6   :  { %v1775_v58 = vpop.f32.mrb[11].mxu0 }
 0x2d7   :  { %v1490_v15 = vmin.f32 %v3572_v1, 0.0  ;;  %v3575_v39 = vadd.f32 %v1775_v58, %v1774_v47  ;;  %v1819_v41 = vpop.f32.mrb[8].mxu1  ;;  %v2097_v16 = vpop.eup %2096  ;;  %vm1458_vm8 = vcmp.gt.f32.partialorder %v3572_v1, 0.0 }
 0x2d8   :  { %v1820_v24 = vpop.f32.mrb[9].mxu1  ;;  %v1713_v46 = vadd.f32 -1.0, %v2097_v16 }
 0x2d9   :  { %v1526_v9 = vmul.f32 1.442695, %v1490_v15  ;;  %v1491_v37 = vmin.f32 %v3575_v39, 0.0  ;;  %v3578_v45 = vadd.f32 %v1820_v24, %v1819_v41  ;;  %v1822_v2 = vpop.f32.mrb[10].mxu1  ;;  %v2099_v32 = vpop.eup %2098  ;;  %vm1459_vm9 = vcmp.gt.f32.partialorder %v3575_v39, 0.0 }
 0x2da   :  { %v1823_v52 = vpop.f32.mrb[11].mxu1  ;;  %v1616_v6 = vsel %vm1456_vm4, %v3560_v53, %v1713_v46  ;;  %v1714_v31 = vadd.f32 -1.0, %v2099_v32 }
 0x2db   :  { %2104 = vpow2.f32 %v1526_v9  ;;  %v1528_v27 = vmul.f32 1.442695, %v1491_v37  ;;  %v1506_v12 = vmin.f32 %v3578_v45, 0.0  ;;  %v3582_v49 = vadd.f32 %v1823_v52, %v1822_v2  ;;  %1648 = vst [vmem:[#allocation5 + $0x10] sm:$0xff] %v1616_v6  ;;  %v2101_v5 = vpop.eup %2100 }
 0x2dc   :  { %v1617_v18 = vsel %vm1457_vm5, %v3563_v19, %v1714_v31  ;;  %v1729_v17 = vadd.f32 -1.0, %v2101_v5  ;;  %vm1474_vm10 = vcmp.gt.f32.partialorder %v3578_v45, 0.0 }
 0x2dd   :  { %2106 = vpow2.f32 %v1528_v27  ;;  %v1558_v22 = vmul.f32 1.442695, %v1506_v12  ;;  %v1507_v51 = vmin.f32 %v3582_v49, 0.0  ;;  %1649 = vst [vmem:[#allocation5 + $0x18] sm:$0xff] %v1617_v18  ;;  %v2103_v11 = vpop.eup %2102  ;;  %vm1475_vm11 = vcmp.gt.f32.partialorder %v3582_v49, 0.0 }
 0x2de   :  { %v1632_v53 = vsel %vm1472_vm6, %v3566_v54, %v1729_v17  ;;  %v1730_v25 = vadd.f32 -1.0, %v2103_v11 }
 0x2df   :  { %2108 = vpow2.f32 %v1558_v22  ;;  %v1560_v63 = vmul.f32 1.442695, %v1507_v51  ;;  %1664 = vst [vmem:[#allocation5 + $0x90] sm:$0xff] %v1632_v53 }
 0x2e0   :  { %v1777_v26 = vpop.f32.mrb[12].mxu0  ;;  %v1633_v20 = vsel %vm1473_vm7, %v3569_v14, %v1730_v25 }
 0x2e1   :  { %v1778_v33 = vpop.f32.mrb[13].mxu0  ;;  %2110 = vpow2.f32 %v1560_v63  ;;  %1665 = vst [vmem:[#allocation5 + $0x98] sm:$0xff] %v1633_v20 }
 0x2e2   :  { %v3588_v0 = vadd.f32 %v1778_v33, %v1777_v26  ;;  %v1780_v8 = vpop.f32.mrb[14].mxu0 }
 0x2e3   :  { %v1781_v48 = vpop.f32.mrb[15].mxu0 }
 0x2e4   :  { %v1492_v13 = vmin.f32 %v3588_v0, 0.0  ;;  %v3594_v21 = vadd.f32 %v1781_v48, %v1780_v8  ;;  %vm1460_vm12 = vcmp.gt.f32.partialorder %v3588_v0, 0.0 }
 0x2e5   :  { %v1825_v19 = vpop.f32.mrb[12].mxu1  ;;  %v2105_v34 = vpop.eup %2104 }
 0x2e6   :  { %v1826_v59 = vpop.f32.mrb[13].mxu1  ;;  %v1530_v50 = vmul.f32 1.442695, %v1492_v13  ;;  %v1493_v61 = vmin.f32 %v3594_v21, 0.0  ;;  %v1715_v54 = vadd.f32 -1.0, %v2105_v34  ;;  %vm1461_vm13 = vcmp.gt.f32.partialorder %v3594_v21, 0.0 }
 0x2e7   :  { %v3598_v42 = vadd.f32 %v1826_v59, %v1825_v19  ;;  %v1828_v40 = vpop.f32.mrb[14].mxu1  ;;  %v2107_v10 = vpop.eup %2106 }
 0x2e8   :  { %v1829_v23 = vpop.f32.mrb[15].mxu1  ;;  %2112 = vpow2.f32 %v1530_v50  ;;  %v1532_v55 = vmul.f32 1.442695, %v1493_v61  ;;  %v1618_v4 = vsel %vm1458_vm8, %v3572_v1, %v1715_v54  ;;  %v1716_v57 = vadd.f32 -1.0, %v2107_v10 }
 0x2e9   :  { %v1508_v28 = vmin.f32 %v3598_v42, 0.0  ;;  %v3603_v7 = vadd.f32 %v1829_v23, %v1828_v40  ;;  %1650 = vst [vmem:[#allocation5 + $0x20] sm:$0xff] %v1618_v4  ;;  %v2109_v60 = vpop.eup %2108  ;;  %vm1476_vm14 = vcmp.gt.f32.partialorder %v3598_v42, 0.0 }
 0x2ea   :  { %2114 = vpow2.f32 %v1532_v55  ;;  %v1619_v56 = vsel %vm1459_vm9, %v3575_v39, %v1716_v57  ;;  %v1731_v36 = vadd.f32 -1.0, %v2109_v60 }
 0x2eb   :  { %v1562_v14 = vmul.f32 1.442695, %v1508_v28  ;;  %v1509_v38 = vmin.f32 %v3603_v7, 0.0  ;;  %v2111_v62 = vpop.eup %2110  ;;  %1651 = vst [vmem:[#allocation5 + $0x28] sm:$0xff] %v1619_v56  ;;  %vm1477_vm15 = vcmp.gt.f32.partialorder %v3603_v7, 0.0 }
 0x2ec   :  { %v1634_v47 = vsel %vm1474_vm10, %v3578_v45, %v1731_v36  ;;  %v1732_v58 = vadd.f32 -1.0, %v2111_v62 }
 0x2ed   :  { %2116 = vpow2.f32 %v1562_v14  ;;  %v1564_v35 = vmul.f32 1.442695, %v1509_v38  ;;  %1666 = vst [vmem:[#allocation5 + $0xa0] sm:$0xff] %v1634_v47 }
 0x2ee   :  { %v1635_v41 = vsel %vm1475_vm11, %v3582_v49, %v1732_v58 }
 0x2ef   :  { %2118 = vpow2.f32 %v1564_v35  ;;  %1667 = vst [vmem:[#allocation5 + $0xa8] sm:$0xff] %v1635_v41 }
 0x2f0   :  { %v1783_v3 = vpop.f32.mrb[16].mxu0 }
 0x2f1   :  { %v1784_v30 = vpop.f32.mrb[17].mxu0 }
 0x2f2   :  { %v3608_v43 = vadd.f32 %v1784_v30, %v1783_v3  ;;  %v1786_v29 = vpop.f32.mrb[18].mxu0  ;;  %v2113_v2 = vpop.eup %2112 }
 0x2f3   :  { %v1787_v1 = vpop.f32.mrb[19].mxu0  ;;  %v1717_v52 = vadd.f32 -1.0, %v2113_v2 }
 0x2f4   :  { %v1494_v44 = vmin.f32 %v3608_v43, 0.0  ;;  %v3614_v15 = vadd.f32 %v1787_v1, %v1786_v29  ;;  %v1831_v39 = vpop.f32.mrb[16].mxu1  ;;  %v2115_v12 = vpop.eup %2114  ;;  %vm1462_vm0 = vcmp.gt.f32.partialorder %v3608_v43, 0.0 }
 0x2f5   :  { %v1832_v24 = vpop.f32.mrb[17].mxu1  ;;  %v1620_v31 = vsel %vm1460_vm12, %v3588_v0, %v1717_v52  ;;  %v1718_v22 = vadd.f32 -1.0, %v2115_v12 }
 0x2f6   :  { %v1534_v9 = vmul.f32 1.442695, %v1494_v44  ;;  %v1495_v16 = vmin.f32 %v3614_v15, 0.0  ;;  %v3618_v37 = vadd.f32 %v1832_v24, %v1831_v39  ;;  %v1834_v45 = vpop.f32.mrb[18].mxu1  ;;  %1652 = vst [vmem:[#allocation5 + $0x30] sm:$0xff] %v1620_v31  ;;  %vm1463_vm1 = vcmp.gt.f32.partialorder %v3614_v15, 0.0 }
 0x2f7   :  { %v1835_v46 = vpop.f32.mrb[19].mxu1  ;;  %v2117_v5 = vpop.eup %2116  ;;  %v1621_v63 = vsel %vm1461_vm13, %v3594_v21, %v1718_v22 }
 0x2f8   :  { %2120 = vpow2.f32 %v1534_v9  ;;  %v1536_v32 = vmul.f32 1.442695, %v1495_v16  ;;  %v1510_v27 = vmin.f32 %v3618_v37, 0.0  ;;  %v3622_v6 = vadd.f32 %v1835_v46, %v1834_v45  ;;  %1653 = vst [vmem:[#allocation5 + $0x38] sm:$0xff] %v1621_v63 }
 0x2f9   :  { %v1733_v8 = vadd.f32 -1.0, %v2117_v5  ;;  %v2119_v13 = vpop.eup %2118  ;;  %vm1478_vm2 = vcmp.gt.f32.partialorder %v3618_v37, 0.0 }
 0x2fa   :  { %2122 = vpow2.f32 %v1536_v32  ;;  %v1566_v51 = vmul.f32 1.442695, %v1510_v27  ;;  %v1511_v18 = vmin.f32 %v3622_v6, 0.0  ;;  %v1734_v59 = vadd.f32 -1.0, %v2119_v13 }
 0x2fb   :  { %v1789_v49 = vpop.f32.mrb[20].mxu0  ;;  %v1636_v19 = vsel %vm1476_vm14, %v3598_v42, %v1733_v8  ;;  %vm1479_vm3 = vcmp.gt.f32.partialorder %v3622_v6, 0.0 }
 0x2fc   :  { %v1790_v26 = vpop.f32.mrb[21].mxu0  ;;  %2124 = vpow2.f32 %v1566_v51  ;;  %v1568_v0 = vmul.f32 1.442695, %v1511_v18  ;;  %1668 = vst [vmem:[#allocation5 + $0xb0] sm:$0xff] %v1636_v19  ;;  %v1637_v23 = vsel %vm1477_vm15, %v3603_v7, %v1734_v59 }
 0x2fd   :  { %v3627_v33 = vadd.f32 %v1790_v26, %v1789_v49  ;;  %v1792_v17 = vpop.f32.mrb[22].mxu0  ;;  %1669 = vst [vmem:[#allocation5 + $0xb8] sm:$0xff] %v1637_v23 }
 0x2fe   :  { %v1793_v11 = vpop.f32.mrb[23].mxu0  ;;  %2126 = vpow2.f32 %v1568_v0 }
 0x2ff   :  { %v1496_v48 = vmin.f32 %v3627_v33, 0.0  ;;  %v3632_v53 = vadd.f32 %v1793_v11, %v1792_v17  ;;  %vm1464_vm4 = vcmp.gt.f32.partialorder %v3627_v33, 0.0 }
 0x300   :  { %v1837_v25 = vpop.f32.mrb[20].mxu1 }
 0x301   :  { %v1838_v20 = vpop.f32.mrb[21].mxu1  ;;  %v1538_v21 = vmul.f32 1.442695, %v1496_v48  ;;  %v1497_v50 = vmin.f32 %v3632_v53, 0.0  ;;  %vm1465_vm5 = vcmp.gt.f32.partialorder %v3632_v53, 0.0 }
 0x302   :  { %v1840_v34 = vpop.f32.mrb[22].mxu1  ;;  %v3637_v61 = vadd.f32 %v1838_v20, %v1837_v25  ;;  %v2121_v54 = vpop.eup %2120 }
 0x303   :  { %v1841_v40 = vpop.f32.mrb[23].mxu1  ;;  %2128 = vpow2.f32 %v1538_v21  ;;  %v1719_v42 = vadd.f32 -1.0, %v2121_v54  ;;  %v1540_v28 = vmul.f32 1.442695, %v1497_v50 }
 0x304   :  { %v3640_v55 = vadd.f32 %v1841_v40, %v1840_v34  ;;  %v1512_v10 = vmin.f32 %v3637_v61, 0.0  ;;  %v2123_v57 = vpop.eup %2122  ;;  %vm1480_vm6 = vcmp.gt.f32.partialorder %v3637_v61, 0.0 }
 0x305   :  { %v1622_v14 = vsel %vm1462_vm0, %v3608_v43, %v1719_v42  ;;  %2130 = vpow2.f32 %v1540_v28  ;;  %v1720_v7 = vadd.f32 -1.0, %v2123_v57 }
 0x306   :  { %v1513_v4 = vmin.f32 %v3640_v55, 0.0  ;;  %v1570_v3 = vmul.f32 1.442695, %v1512_v10  ;;  %1654 = vst [vmem:[#allocation5 + $0x40] sm:$0xff] %v1622_v14  ;;  %v2125_v56 = vpop.eup %2124  ;;  %vm1481_vm7 = vcmp.gt.f32.partialorder %v3640_v55, 0.0 }
 0x307   :  { %v1623_v62 = vsel %vm1463_vm1, %v3614_v15, %v1720_v7  ;;  %v1735_v35 = vadd.f32 -1.0, %v2125_v56 }
 0x308   :  { %v1572_v38 = vmul.f32 1.442695, %v1513_v4  ;;  %2132 = vpow2.f32 %v1570_v3  ;;  %1655 = vst [vmem:[#allocation5 + $0x48] sm:$0xff] %v1623_v62  ;;  %v2127_v44 = vpop.eup %2126 }
 0x309   :  { %v1795_v60 = vpop.f32.mrb[24].mxu0  ;;  %v1638_v39 = vsel %vm1478_vm2, %v3618_v37, %v1735_v35  ;;  %v1736_v9 = vadd.f32 -1.0, %v2127_v44 }
 0x30a   :  { %v1796_v30 = vpop.f32.mrb[25].mxu0  ;;  %2134 = vpow2.f32 %v1572_v38  ;;  %1670 = vst [vmem:[#allocation5 + $0xc0] sm:$0xff] %v1638_v39 }
 0x30b   :  { %v3647_v36 = vadd.f32 %v1796_v30, %v1795_v60  ;;  %v1798_v29 = vpop.f32.mrb[26].mxu0  ;;  %v1639_v52 = vsel %vm1479_vm3, %v3622_v6, %v1736_v9 }
 0x30c   :  { %v1799_v1 = vpop.f32.mrb[27].mxu0  ;;  %1671 = vst [vmem:[#allocation5 + $0xc8] sm:$0xff] %v1639_v52 }
 0x30d   :  { %v1498_v43 = vmin.f32 %v3647_v36, 0.0  ;;  %v3652_v47 = vadd.f32 %v1799_v1, %v1798_v29  ;;  %v1843_v58 = vpop.f32.mrb[24].mxu1  ;;  %v2129_v45 = vpop.eup %2128  ;;  %vm1466_vm8 = vcmp.gt.f32.partialorder %v3647_v36, 0.0 }
 0x30e   :  { %v1844_v41 = vpop.f32.mrb[25].mxu1  ;;  %v1721_v32 = vadd.f32 -1.0, %v2129_v45 }
 0x30f   :  { %v1542_v24 = vmul.f32 1.442695, %v1498_v43  ;;  %v1499_v15 = vmin.f32 %v3652_v47, 0.0  ;;  %v1846_v16 = vpop.f32.mrb[26].mxu1  ;;  %v3657_v2 = vadd.f32 %v1844_v41, %v1843_v58  ;;  %v2131_v22 = vpop.eup %2130  ;;  %vm1467_vm9 = vcmp.gt.f32.partialorder %v3652_v47, 0.0 }
 0x310   :  { %v1847_v46 = vpop.f32.mrb[27].mxu1  ;;  %v1624_v51 = vsel %vm1464_vm4, %v3627_v33, %v1721_v32  ;;  %v1722_v6 = vadd.f32 -1.0, %v2131_v22 }
 0x311   :  { %2136 = vpow2.f32 %v1542_v24  ;;  %v1544_v27 = vmul.f32 1.442695, %v1499_v15  ;;  %v1801_v12 = vpop.f32.mrb[28].mxu0  ;;  %v1514_v37 = vmin.f32 %v3657_v2, 0.0  ;;  %v3662_v49 = vadd.f32 %v1847_v46, %v1846_v16  ;;  %1656 = vst [vmem:[#allocation5 + $0x50] sm:$0xff] %v1624_v51 }
 0x312   :  { %v1802_v31 = vpop.f32.mrb[29].mxu0  ;;  %v2133_v8 = vpop.eup %2132  ;;  %v1625_v33 = vsel %vm1465_vm5, %v3632_v53, %v1722_v6  ;;  %vm1482_vm10 = vcmp.gt.f32.partialorder %v3657_v2, 0.0 }
 0x313   :  { %2138 = vpow2.f32 %v1544_v27  ;;  %v3665_v26 = vadd.f32 %v1802_v31, %v1801_v12  ;;  %v1804_v5 = vpop.f32.mrb[30].mxu0  ;;  %v1574_v18 = vmul.f32 1.442695, %v1514_v37  ;;  %v1515_v17 = vmin.f32 %v3662_v49, 0.0  ;;  %1657 = vst [vmem:[#allocation5 + $0x58] sm:$0xff] %v1625_v33 }
 0x314   :  { %v1805_v63 = vpop.f32.mrb[31].mxu0  ;;  %v2135_v25 = vpop.eup %2134  ;;  %v1737_v13 = vadd.f32 -1.0, %v2133_v8  ;;  %vm1483_vm11 = vcmp.gt.f32.partialorder %v3662_v49, 0.0 }
 0x315   :  { %v1500_v11 = vmin.f32 %v3665_v26, 0.0  ;;  %v1806_v0 = vadd.f32 %v1805_v63, %v1804_v5  ;;  %v1849_v48 = vpop.f32.mrb[28].mxu1  ;;  %2140 = vpow2.f32 %v1574_v18  ;;  %v1576_v19 = vmul.f32 1.442695, %v1515_v17 }
 0x316   :  { %v1850_v20 = vpop.f32.mrb[29].mxu1  ;;  %v1738_v59 = vadd.f32 -1.0, %v2135_v25  ;;  %v1640_v40 = vsel %vm1480_vm6, %v3637_v61, %v1737_v13  ;;  %vm1468_vm12 = vcmp.gt.f32.partialorder %v3665_v26, 0.0 }
 0x317   :  { %v1546_v21 = vmul.f32 1.442695, %v1500_v11  ;;  %v1501_v34 = vmin.f32 %v1806_v0, 0.0  ;;  %v1852_v50 = vpop.f32.mrb[30].mxu1  ;;  %2142 = vpow2.f32 %v1576_v19  ;;  %v1851_v54 = vadd.f32 %v1850_v20, %v1849_v48  ;;  %1672 = vst [vmem:[#allocation5 + $0xd0] sm:$0xff] %v1640_v40 }
 0x318   :  { %v1853_v23 = vpop.f32.mrb[31].mxu1  ;;  %v1641_v53 = vsel %vm1481_vm7, %v3640_v55, %v1738_v59  ;;  %vm1469_vm13 = vcmp.gt.f32.partialorder %v1806_v0, 0.0 }
 0x319   :  { %2144 = vpow2.f32 %v1546_v21  ;;  %v1548_v42 = vmul.f32 1.442695, %v1501_v34  ;;  %v1854_v28 = vadd.f32 %v1853_v23, %v1852_v50  ;;  %1673 = vst [vmem:[#allocation5 + $0xd8] sm:$0xff] %v1641_v53  ;;  %v1516_v10 = vmin.f32 %v1851_v54, 0.0 }
 0x31a   :  { %vm1484_vm14 = vcmp.gt.f32.partialorder %v1851_v54, 0.0 }
 0x31b   :  { %v2137_v4 = vpop.eup %2136  ;;  %2146 = vpow2.f32 %v1548_v42  ;;  %v1517_v57 = vmin.f32 %v1854_v28, 0.0  ;;  %v1578_v3 = vmul.f32 1.442695, %v1516_v10  ;;  %vm1485_vm15 = vcmp.gt.f32.partialorder %v1854_v28, 0.0 }
 0x31c   :  { %v1723_v14 = vadd.f32 -1.0, %v2137_v4 }
 0x31d   :  { %v2139_v60 = vpop.eup %2138  ;;  %v1580_v61 = vmul.f32 1.442695, %v1517_v57  ;;  %2148 = vpow2.f32 %v1578_v3 }
 0x31e   :  { %v1626_v7 = vsel %vm1466_vm8, %v3647_v36, %v1723_v14  ;;  %v1724_v38 = vadd.f32 -1.0, %v2139_v60 }
 0x31f   :  { %1658 = vst [vmem:[#allocation5 + $0x60] sm:$0xff] %v1626_v7  ;;  %2150 = vpow2.f32 %v1580_v61  ;;  %v2141_v55 = vpop.eup %2140 }
 0x320   :  { %v1627_v30 = vsel %vm1467_vm9, %v3652_v47, %v1724_v38  ;;  %v1739_v56 = vadd.f32 -1.0, %v2141_v55 }
 0x321   :  { %1659 = vst [vmem:[#allocation5 + $0x68] sm:$0xff] %v1627_v30  ;;  %v2143_v29 = vpop.eup %2142 }
 0x322   :  { %v1642_v35 = vsel %vm1482_vm10, %v3657_v2, %v1739_v56  ;;  %v1740_v1 = vadd.f32 -1.0, %v2143_v29 }
 0x323   :  { %v2145_v62 = vpop.eup %2144  ;;  %1674 = vst [vmem:[#allocation5 + $0xe0] sm:$0xff] %v1642_v35 }
 0x324   :  { %v1725_v36 = vadd.f32 -1.0, %v2145_v62  ;;  %v1643_v58 = vsel %vm1483_vm11, %v3662_v49, %v1740_v1 }
 0x325   :  { %v2147_v43 = vpop.eup %2146  ;;  %1675 = vst [vmem:[#allocation5 + $0xe8] sm:$0xff] %v1643_v58 }
 0x326   :  { %v1628_v47 = vsel %vm1468_vm12, %v3665_v26, %v1725_v36  ;;  %v1726_v44 = vadd.f32 -1.0, %v2147_v43 }
 0x327   :  { %1660 = vst [vmem:[#allocation5 + $0x70] sm:$0xff] %v1628_v47  ;;  %v2149_v39 = vpop.eup %2148 }
 0x328   :  { %v1629_v41 = vsel %vm1469_vm13, %v1806_v0, %v1726_v44  ;;  %v1741_v24 = vadd.f32 -1.0, %v2149_v39 }
 0x329   :  { %v2151_v9 = vpop.eup %2150  ;;  %1661 = vst [vmem:[#allocation5 + $0x78] sm:$0xff] %v1629_v41 }
 0x32a   :  { %v1742_v15 = vadd.f32 -1.0, %v2151_v9  ;;  %v1644_v16 = vsel %vm1484_vm14, %v1851_v54, %v1741_v24 }
 0x32b   :  { %1676 = vst [vmem:[#allocation5 + $0xf0] sm:$0xff] %v1644_v16 }
 0x32c   :  { %v1645_v45 = vsel %vm1485_vm15, %v1854_v28, %v1742_v15 }
 0x32d   :  { %1677 = vst [vmem:[#allocation5 + $0xf8] sm:$0xff] %v1645_v45 }
 0x32e   :  { %2185 = shalt.err (!%p2182_p12)
}
 0x32f   :  { %s2186_s22 = scalar_lea.hbm %s3701_s4, 4096 }
 0x330   :  { %p2187_p13 = scmp.ne.s32.totalorder %s3701_s4, %s2186_s22  ;;  %p2190_p0 = scmp.lt.u32.totalorder %s2186_s22, %s3701_s4 }
 0x332   :  { %p2192_p1 = pnand %p2190_p0, %p2187_p13 }
 0x334   :  { %2195 = shalt.err (!%p2192_p1)
}
 0x335   :  { %s2205_s27 = smov 128   ;;  %s2206_s28 = smov 8  }
 0x336   :  { %1689 = dma.vmem_to_hbm [thread:$0]  %s1684_s19, 4096, %s3701_s4, [#allocation4], %s2205_s27, %s2205_s27, %s2206_s28  }
 0x337   :  { %2198 = dma.done.wait [#allocation4], 4096  }
 0x338   :  { %2199 = vsyncadd [#allocation4], 4294963200 }
 0x339   :  { %1693 = vsyncpa [#allocation3], 1 }
 0x33a   :  { %1694 = vsyncpa [#allocation4], 1 }

</bundles_post_ra>
